<compile_context>
chip_gen: v5e
topology: v5e:2x2
jax: 0.10.0
libtpu: 0.0.40
codegen_flags: <defaults>
</compile_context>

<pallas_src>
import functools

import jax
import jax.numpy as jnp
import numpy as np
from jax.experimental import pallas as pl
from jax.experimental.pallas import tpu as pltpu

INCHANNELS = 1
CIN1 = INCHANNELS + 1          # conv1 input channels (t-channel + data)
C_HIDDEN = 16
KH = KW = 3
NTAPS = KH * KW
BN_EPS = 1e-5


@functools.lru_cache(maxsize=8)
def _border_masks(B, H, W):
    """Packed (NTAPS, rows) f32 border-validity masks, built at trace time.

    Tap k = (dy, dx) reads pixel (h+dy, w+dx); with 'same' zero padding its
    contribution is zero when that pixel is outside the image.  The in-kernel
    flattened-pixel roll wraps across image / batch edges, and these masks
    zero exactly those wrapped reads.
    """
    rows = B * H * W
    col = np.arange(rows)
    ww = col % W
    hh = (col // W) % H
    m = np.zeros((NTAPS, rows), np.float32)
    for k in range(NTAPS):
        dy, dx = k // KW - 1, k % KW - 1
        valid = (hh + dy >= 0) & (hh + dy < H) & (ww + dx >= 0) & (ww + dx < W)
        m[k] = valid.astype(np.float32)
    return jnp.asarray(m)


def _res_block_kernel(t_ref, x_ref, mask_ref, w1t_ref, w1x_ref, b1_ref,
                      gamma_ref, beta_ref, w2_ref, b2_ref, out_ref, *, B, H, W):
    """conv3x3 -> ReLU -> BatchNorm(train) -> conv3x3 -> ReLU (scratch-free).

    t_ref     : (1,)  SMEM         scalar time
    x_ref     : (1, rows)          flattened input pixels, rows = B*H*W
    mask_ref  : (9, rows)          per-tap border masks (constant slab)
    w1t_ref   : (16, 9)            conv1 weights for the ones*t channel
    w1x_ref   : (16, 9)            conv1 weights for the data channel
    b1/gamma/beta : (16, 1)
    w2_ref    : (1, 144)           conv2 weights, column = tap*16 + c
    b2_ref    : (1, 1)
    out_ref   : (1, rows)          lane-dense output slab
    """
    rows = B * H * W
    offs = [(k // KW - 1) * W + (k % KW - 1) for k in range(NTAPS)]

    def rolled(v, k):
        """Flattened-pixel shift so position p holds source pixel p + offs[k]."""
        if offs[k] == 0:
            return v
        return pltpu.roll(v, shift=(-offs[k]) % rows, axis=1)

    # ---- conv1: one K=9 matmul for the data channel + one for the t channel -
    masks = mask_ref[...]                                    # (9, rows)
    x_row = x_ref[...]                                       # (1, rows)
    x_taps = jnp.concatenate(
        [rolled(x_row, k) for k in range(NTAPS)], axis=0)    # (9, rows) value
    lhs_x = x_taps * masks                                   # one packed multiply
    t = t_ref[0]
    acc1 = (jnp.dot(w1x_ref[...], lhs_x, preferred_element_type=jnp.float32)
            + jnp.dot(w1t_ref[...] * t, masks,               # t-channel is constant
                      preferred_element_type=jnp.float32)
            + b1_ref[...])
    y1 = jnp.maximum(acc1, 0.0)                              # (16, rows)

    # ---- BatchNorm2d, training mode: stats over (N, H, W), biased variance --
    inv_n = 1.0 / rows
    mean = jnp.sum(y1, axis=1, keepdims=True) * inv_n        # (16, 1)
    diff = y1 - mean
    var = jnp.sum(diff * diff, axis=1, keepdims=True) * inv_n
    y1n = diff * (jax.lax.rsqrt(var + BN_EPS) * gamma_ref[...]) + beta_ref[...]

    # ---- conv2 + ReLU: per-tap K=16 MXU accumulation (no im2col scratch) ----
    acc2 = jnp.zeros((INCHANNELS, rows), jnp.float32)
    for k in range(NTAPS):
        if offs[k] == 0:
            tap = y1n                                        # center tap: mask is all ones
        else:
            tap = rolled(y1n, k) * mask_ref[k:k + 1, :]
        acc2 = acc2 + jnp.dot(w2_ref[:, k * C_HIDDEN:(k + 1) * C_HIDDEN], tap,
                              preferred_element_type=jnp.float32)
    out_ref[...] = jnp.maximum(acc2 + b2_ref[...], 0.0)      # (1, rows)


def prepare_params(params):
    """One-time conversion from PyTorch (OIHW) layout to kernel layout."""
    w1 = params["w1"]                                   # (16, 2, 3, 3); ci 0 = t, ci 1 = x
    w1t = w1[:, 0].reshape(C_HIDDEN, NTAPS)
    w1x = w1[:, 1].reshape(C_HIDDEN, NTAPS)
    # conv2: column index = (ky*3 + kx)*16 + c  -> O,KH,KW,I flatten
    w2 = jnp.transpose(params["w2"], (0, 2, 3, 1)).reshape(
        INCHANNELS, NTAPS * C_HIDDEN)
    return dict(
        w1t=w1t.astype(jnp.float32),
        w1x=w1x.astype(jnp.float32),
        b1=params["b1"].reshape(C_HIDDEN, 1).astype(jnp.float32),
        gamma=params["gamma"].reshape(C_HIDDEN, 1).astype(jnp.float32),
        beta=params["beta"].reshape(C_HIDDEN, 1).astype(jnp.float32),
        w2=w2.astype(jnp.float32),
        b2=params["b2"].reshape(INCHANNELS, 1).astype(jnp.float32),
    )


def res_block_pallas(t, inp_nchw, kparams):
    """Apply t-concat + res_block via the Pallas kernel.  inp_nchw: (B, 1, H, W)."""
    B, C, H, W = inp_nchw.shape
    assert C == INCHANNELS
    rows = B * H * W
    # Lane alignment: padded lanes would otherwise leak (bias + ReLU) values
    # into the BatchNorm batch statistics, which divide by the true row count.
    assert rows % 128 == 0, "B*H*W must be a multiple of 128"

    x_flat = inp_nchw.astype(jnp.float32).reshape(1, rows)   # (b, h, w) flat order
    t_arr = jnp.asarray(t, jnp.float32).reshape(1)
    masks = _border_masks(B, H, W)                           # (9, rows)

    # Rough live footprint: double-buffered I/O slabs + a few (16, rows) f32
    # activations; floor at the scoped default, cap below v7x physical VMEM.
    est = 4 * rows * (2 * (1 + NTAPS + 1) + 8 * C_HIDDEN) + (2 << 20)
    vmem_limit = int(min(48 << 20, max(32 << 20, est)))

    kernel = functools.partial(_res_block_kernel, B=B, H=H, W=W)
    out_flat = pl.pallas_call(
        kernel,
        out_shape=jax.ShapeDtypeStruct((INCHANNELS, rows), jnp.float32),
        grid=(1,),
        in_specs=[
            pl.BlockSpec(memory_space=pltpu.MemorySpace.SMEM),               # t
            pl.BlockSpec((1, rows), lambda i: (0, 0)),                       # x
            pl.BlockSpec((NTAPS, rows), lambda i: (0, 0)),                   # masks
            pl.BlockSpec((C_HIDDEN, NTAPS), lambda i: (0, 0)),               # w1t
            pl.BlockSpec((C_HIDDEN, NTAPS), lambda i: (0, 0)),               # w1x
            pl.BlockSpec((C_HIDDEN, 1), lambda i: (0, 0)),                   # b1
            pl.BlockSpec((C_HIDDEN, 1), lambda i: (0, 0)),                   # gamma
            pl.BlockSpec((C_HIDDEN, 1), lambda i: (0, 0)),                   # beta
            pl.BlockSpec((INCHANNELS, NTAPS * C_HIDDEN), lambda i: (0, 0)),  # w2
            pl.BlockSpec((INCHANNELS, 1), lambda i: (0, 0)),                 # b2
        ],
        out_specs=pl.BlockSpec((INCHANNELS, rows), lambda i: (0, 0)),
        compiler_params=pltpu.CompilerParams(
            dimension_semantics=("arbitrary",),
            vmem_limit_bytes=vmem_limit),
    )(t_arr, x_flat, masks, kparams["w1t"], kparams["w1x"], kparams["b1"],
      kparams["gamma"], kparams["beta"], kparams["w2"], kparams["b2"])

    return out_flat.reshape(B, INCHANNELS, H, W)              # back to NCHW


def model_forward(t, inp, kernel_params):
    """Mirrors Model.forward (NCHW in / NCHW out)."""
    reduce_out = False
    if inp.shape[-3] > INCHANNELS:
        # TODO(synk): mirrors the PyTorch unsqueeze/repeat glue, which does not
        # typecheck for inchannels > 1 anyway; not exercised here.
        inp = jnp.expand_dims(inp, -3)
        inp = jnp.tile(inp, (1, INCHANNELS, 1, 1))
        reduce_out = True
    out = res_block_pallas(t, inp, kernel_params)
    if reduce_out:
        return jnp.squeeze(out, axis=-3)
    return out


def model_forward_ref(t, inp, params):
    """Pure-JAX reference of the same forward pass (PyTorch-layout params)."""
    reduce_out = False
    if inp.shape[-3] > INCHANNELS:
        inp = jnp.expand_dims(inp, -3)
        inp = jnp.tile(inp, (1, INCHANNELS, 1, 1))
        reduce_out = True
    a = jnp.ones(inp.shape, inp.dtype) * t
    x = jnp.concatenate((a, inp), axis=1)
    dn = ("NCHW", "OIHW", "NCHW")
    y1 = jax.lax.conv_general_dilated(x, params["w1"], (1, 1), "SAME",
                                      dimension_numbers=dn)
    y1 = jnp.maximum(y1 + params["b1"][None, :, None, None], 0.0)
    mean = jnp.mean(y1, axis=(0, 2, 3), keepdims=True)
    var = jnp.mean((y1 - mean) ** 2, axis=(0, 2, 3), keepdims=True)
    y1 = (y1 - mean) / jnp.sqrt(var + BN_EPS)
    y1 = y1 * params["gamma"][None, :, None, None] + params["beta"][None, :, None, None]
    y2 = jax.lax.conv_general_dilated(y1, params["w2"], (1, 1), "SAME",
                                      dimension_numbers=dn)
    out = jnp.maximum(y2 + params["b2"][None, :, None, None], 0.0)
    if reduce_out:
        return jnp.squeeze(out, axis=-3)
    return out


def init_params(key):
    """Deterministic synthetic init matching the module's parameter shapes."""
    k1, k2, k3, k4, k5, k6 = jax.random.split(key, 6)
    bnd1 = 1.0 / np.sqrt(CIN1 * KH * KW)
    bnd2 = 1.0 / np.sqrt(C_HIDDEN * KH * KW)
    return dict(
        w1=jax.random.uniform(k1, (C_HIDDEN, CIN1, KH, KW), jnp.float32, -bnd1, bnd1),
        b1=jax.random.uniform(k2, (C_HIDDEN,), jnp.float32, -bnd1, bnd1),
        w2=jax.random.uniform(k3, (INCHANNELS, C_HIDDEN, KH, KW), jnp.float32, -bnd2, bnd2),
        b2=jax.random.uniform(k4, (INCHANNELS,), jnp.float32, -bnd2, bnd2),
        gamma=1.0 + 0.1 * jax.random.normal(k5, (C_HIDDEN,), jnp.float32),
        beta=0.1 * jax.random.normal(k6, (C_HIDDEN,), jnp.float32),
    )


if __name__ == "__main__":
    key = jax.random.PRNGKey(0)
    kp, kx = jax.random.split(key)
    params = init_params(kp)                  # PyTorch-layout params
    kernel_params = prepare_params(params)    # one-time kernel-layout conversion

    B, H, W = 2, 16, 16
    x = jax.random.normal(kx, (B, INCHANNELS, H, W), jnp.float32)
    t = jnp.float32(0.5)

    out = model_forward(t, x, kernel_params)
    out = jax.block_until_ready(out)
    assert out.shape == (B, INCHANNELS, H, W)

    ref = model_forward_ref(t, x, params)
    np.testing.assert_allclose(np.asarray(out), np.asarray(ref), rtol=2e-2, atol=2e-3)

    print("KERNEL_OK")
</pallas_src>

<mosaic_0001>
module attributes {stable_mosaic.version = 11 : i64} {
  func.func @_res_block_kernel(%arg0: i32, %arg1: memref<1xf32, #tpu.memory_space<smem>>, %arg2: memref<1x512xf32, #tpu.memory_space<vmem>>, %arg3: memref<9x512xf32, #tpu.memory_space<vmem>>, %arg4: memref<16x9xf32, #tpu.memory_space<vmem>>, %arg5: memref<16x9xf32, #tpu.memory_space<vmem>>, %arg6: memref<16x1xf32, #tpu.memory_space<vmem>>, %arg7: memref<16x1xf32, #tpu.memory_space<vmem>>, %arg8: memref<16x1xf32, #tpu.memory_space<vmem>>, %arg9: memref<1x144xf32, #tpu.memory_space<vmem>>, %arg10: memref<1x1xf32, #tpu.memory_space<vmem>>, %arg11: memref<1x512xf32, #tpu.memory_space<vmem>>) attributes {dimension_semantics = [#tpu.dimension_semantics<arbitrary>], iteration_bounds = array<i64: 1>, scalar_prefetch = 0 : i64, scratch_operands = 0 : i64, tpu.core_type = #tpu.core_type<tc>, window_params = [{transform_indices = @transform_0, window_bounds = array<i64: 1>}, {pipeline_mode = #tpu.pipeline_mode<synchronous>, transform_indices = @transform_1, window_bounds = array<i64: 1, 512>}, {pipeline_mode = #tpu.pipeline_mode<synchronous>, transform_indices = @transform_2, window_bounds = array<i64: 9, 512>}, {pipeline_mode = #tpu.pipeline_mode<synchronous>, transform_indices = @transform_3, window_bounds = array<i64: 16, 9>}, {pipeline_mode = #tpu.pipeline_mode<synchronous>, transform_indices = @transform_4, window_bounds = array<i64: 16, 9>}, {pipeline_mode = #tpu.pipeline_mode<synchronous>, transform_indices = @transform_5, window_bounds = array<i64: 16, 1>}, {pipeline_mode = #tpu.pipeline_mode<synchronous>, transform_indices = @transform_6, window_bounds = array<i64: 16, 1>}, {pipeline_mode = #tpu.pipeline_mode<synchronous>, transform_indices = @transform_7, window_bounds = array<i64: 16, 1>}, {pipeline_mode = #tpu.pipeline_mode<synchronous>, transform_indices = @transform_8, window_bounds = array<i64: 1, 144>}, {pipeline_mode = #tpu.pipeline_mode<synchronous>, transform_indices = @transform_9, window_bounds = array<i64: 1, 1>}, {pipeline_mode = #tpu.pipeline_mode<synchronous>, transform_indices = @transform_10, window_bounds = array<i64: 1, 512>}]} {
    %c0 = arith.constant 0 : index
    %c0_0 = arith.constant 0 : index
    %0 = vector.load %arg3[%c0, %c0_0] : memref<9x512xf32, #tpu.memory_space<vmem>>, vector<9x512xf32>
    %c0_1 = arith.constant 0 : index
    %c0_2 = arith.constant 0 : index
    %1 = vector.load %arg2[%c0_1, %c0_2] : memref<1x512xf32, #tpu.memory_space<vmem>>, vector<1x512xf32>
    %c17_i32 = arith.constant 17 : i32
    %2 = tpu.dynamic_rotate %1 by %c17_i32 dim 1 : vector<1x512xf32>, i32 -> vector<1x512xf32>
    %c16_i32 = arith.constant 16 : i32
    %3 = tpu.dynamic_rotate %1 by %c16_i32 dim 1 : vector<1x512xf32>, i32 -> vector<1x512xf32>
    %c15_i32 = arith.constant 15 : i32
    %4 = tpu.dynamic_rotate %1 by %c15_i32 dim 1 : vector<1x512xf32>, i32 -> vector<1x512xf32>
    %c1_i32 = arith.constant 1 : i32
    %5 = tpu.dynamic_rotate %1 by %c1_i32 dim 1 : vector<1x512xf32>, i32 -> vector<1x512xf32>
    %c511_i32 = arith.constant 511 : i32
    %6 = tpu.dynamic_rotate %1 by %c511_i32 dim 1 : vector<1x512xf32>, i32 -> vector<1x512xf32>
    %c497_i32 = arith.constant 497 : i32
    %7 = tpu.dynamic_rotate %1 by %c497_i32 dim 1 : vector<1x512xf32>, i32 -> vector<1x512xf32>
    %c496_i32 = arith.constant 496 : i32
    %8 = tpu.dynamic_rotate %1 by %c496_i32 dim 1 : vector<1x512xf32>, i32 -> vector<1x512xf32>
    %c495_i32 = arith.constant 495 : i32
    %9 = tpu.dynamic_rotate %1 by %c495_i32 dim 1 : vector<1x512xf32>, i32 -> vector<1x512xf32>
    %10 = tpu.concatenate %2, %3, %4, %5, %1, %6, %7, %8, %9 in 0 : vector<1x512xf32>, vector<1x512xf32>, vector<1x512xf32>, vector<1x512xf32>, vector<1x512xf32>, vector<1x512xf32>, vector<1x512xf32>, vector<1x512xf32>, vector<1x512xf32> -> vector<9x512xf32>
    %11 = arith.mulf %10, %0 : vector<9x512xf32>
    %c0_3 = arith.constant 0 : index
    %12 = memref.load %arg1[%c0_3] : memref<1xf32, #tpu.memory_space<smem>>
    %c0_4 = arith.constant 0 : index
    %c0_5 = arith.constant 0 : index
    %13 = vector.load %arg5[%c0_4, %c0_5] : memref<16x9xf32, #tpu.memory_space<vmem>>, vector<16x9xf32>
    %cst = arith.constant dense<0.000000e+00> : vector<16x512xf32>
    %14 = tpu.matmul %13, %11, %cst {dimension_numbers = #tpu.dot_dimension_numbers<[1], [0], [0], [1], [0, 0, 1, 1], [], []>} : vector<16x9xf32>, vector<9x512xf32>, vector<16x512xf32> -> vector<16x512xf32>
    %c0_6 = arith.constant 0 : index
    %c0_7 = arith.constant 0 : index
    %15 = vector.load %arg4[%c0_6, %c0_7] : memref<16x9xf32, #tpu.memory_space<vmem>>, vector<16x9xf32>
    %16 = vector.broadcast %12 : f32 to vector<16x9xf32>
    %17 = arith.mulf %15, %16 : vector<16x9xf32>
    %cst_8 = arith.constant dense<0.000000e+00> : vector<16x512xf32>
    %18 = tpu.matmul %17, %0, %cst_8 {dimension_numbers = #tpu.dot_dimension_numbers<[1], [0], [0], [1], [0, 0, 1, 1], [], []>} : vector<16x9xf32>, vector<9x512xf32>, vector<16x512xf32> -> vector<16x512xf32>
    %19 = arith.addf %14, %18 : vector<16x512xf32>
    %c0_9 = arith.constant 0 : index
    %c0_10 = arith.constant 0 : index
    %20 = vector.load %arg6[%c0_9, %c0_10] : memref<16x1xf32, #tpu.memory_space<vmem>>, vector<16x1xf32>
    %21 = vector.broadcast %20 : vector<16x1xf32> to vector<16x512xf32>
    %22 = arith.addf %19, %21 : vector<16x512xf32>
    %cst_11 = arith.constant 0.000000e+00 : f32
    %23 = vector.broadcast %cst_11 : f32 to vector<16x512xf32>
    %24 = arith.maximumf %22, %23 : vector<16x512xf32>
    %cst_12 = arith.constant dense<0.000000e+00> : vector<16xf32>
    %25 = vector.multi_reduction <add>, %24, %cst_12 [1] : vector<16x512xf32> to vector<16xf32>
    %26 = vector.shape_cast %25 : vector<16xf32> to vector<16x1xf32>
    %cst_13 = arith.constant 0.001953125 : f32
    %27 = vector.broadcast %cst_13 : f32 to vector<16x1xf32>
    %28 = arith.mulf %26, %27 : vector<16x1xf32>
    %29 = vector.broadcast %28 : vector<16x1xf32> to vector<16x512xf32>
    %30 = arith.subf %24, %29 : vector<16x512xf32>
    %31 = arith.mulf %30, %30 : vector<16x512xf32>
    %cst_14 = arith.constant dense<0.000000e+00> : vector<16xf32>
    %32 = vector.multi_reduction <add>, %31, %cst_14 [1] : vector<16x512xf32> to vector<16xf32>
    %33 = vector.shape_cast %32 : vector<16xf32> to vector<16x1xf32>
    %cst_15 = arith.constant 0.001953125 : f32
    %34 = vector.broadcast %cst_15 : f32 to vector<16x1xf32>
    %35 = arith.mulf %33, %34 : vector<16x1xf32>
    %cst_16 = arith.constant 9.99999974E-6 : f32
    %36 = vector.broadcast %cst_16 : f32 to vector<16x1xf32>
    %37 = arith.addf %35, %36 : vector<16x1xf32>
    %38 = math.rsqrt %37 : vector<16x1xf32>
    %c0_17 = arith.constant 0 : index
    %c0_18 = arith.constant 0 : index
    %39 = vector.load %arg7[%c0_17, %c0_18] : memref<16x1xf32, #tpu.memory_space<vmem>>, vector<16x1xf32>
    %40 = arith.mulf %38, %39 : vector<16x1xf32>
    %41 = vector.broadcast %40 : vector<16x1xf32> to vector<16x512xf32>
    %42 = arith.mulf %30, %41 : vector<16x512xf32>
    %c0_19 = arith.constant 0 : index
    %c0_20 = arith.constant 0 : index
    %43 = vector.load %arg8[%c0_19, %c0_20] : memref<16x1xf32, #tpu.memory_space<vmem>>, vector<16x1xf32>
    %44 = vector.broadcast %43 : vector<16x1xf32> to vector<16x512xf32>
    %45 = arith.addf %42, %44 : vector<16x512xf32>
    %cst_21 = arith.constant 0.000000e+00 : f32
    %46 = vector.broadcast %cst_21 : f32 to vector<1x512xf32>
    %c17_i32_22 = arith.constant 17 : i32
    %47 = tpu.dynamic_rotate %45 by %c17_i32_22 dim 1 : vector<16x512xf32>, i32 -> vector<16x512xf32>
    %c0_23 = arith.constant 0 : index
    %c0_24 = arith.constant 0 : index
    %48 = vector.load %arg3[%c0_23, %c0_24] : memref<9x512xf32, #tpu.memory_space<vmem>>, vector<1x512xf32>
    %49 = vector.broadcast %48 : vector<1x512xf32> to vector<16x512xf32>
    %50 = arith.mulf %47, %49 : vector<16x512xf32>
    %c0_25 = arith.constant 0 : index
    %c0_26 = arith.constant 0 : index
    %51 = vector.load %arg9[%c0_25, %c0_26] : memref<1x144xf32, #tpu.memory_space<vmem>>, vector<1x16xf32>
    %cst_27 = arith.constant dense<0.000000e+00> : vector<1x512xf32>
    %52 = tpu.matmul %51, %50, %cst_27 {dimension_numbers = #tpu.dot_dimension_numbers<[1], [0], [0], [1], [0, 0, 1, 1], [], []>} : vector<1x16xf32>, vector<16x512xf32>, vector<1x512xf32> -> vector<1x512xf32>
    %53 = arith.addf %46, %52 : vector<1x512xf32>
    %c16_i32_28 = arith.constant 16 : i32
    %54 = tpu.dynamic_rotate %45 by %c16_i32_28 dim 1 : vector<16x512xf32>, i32 -> vector<16x512xf32>
    %c1 = arith.constant 1 : index
    %c0_29 = arith.constant 0 : index
    %55 = vector.load %arg3[%c1, %c0_29] : memref<9x512xf32, #tpu.memory_space<vmem>>, vector<1x512xf32>
    %56 = vector.broadcast %55 : vector<1x512xf32> to vector<16x512xf32>
    %57 = arith.mulf %54, %56 : vector<16x512xf32>
    %c0_30 = arith.constant 0 : index
    %c16 = arith.constant 16 : index
    %58 = vector.load %arg9[%c0_30, %c16] : memref<1x144xf32, #tpu.memory_space<vmem>>, vector<1x16xf32>
    %cst_31 = arith.constant dense<0.000000e+00> : vector<1x512xf32>
    %59 = tpu.matmul %58, %57, %cst_31 {dimension_numbers = #tpu.dot_dimension_numbers<[1], [0], [0], [1], [0, 0, 1, 1], [], []>} : vector<1x16xf32>, vector<16x512xf32>, vector<1x512xf32> -> vector<1x512xf32>
    %60 = arith.addf %53, %59 : vector<1x512xf32>
    %c15_i32_32 = arith.constant 15 : i32
    %61 = tpu.dynamic_rotate %45 by %c15_i32_32 dim 1 : vector<16x512xf32>, i32 -> vector<16x512xf32>
    %c2 = arith.constant 2 : index
    %c0_33 = arith.constant 0 : index
    %62 = vector.load %arg3[%c2, %c0_33] : memref<9x512xf32, #tpu.memory_space<vmem>>, vector<1x512xf32>
    %63 = vector.broadcast %62 : vector<1x512xf32> to vector<16x512xf32>
    %64 = arith.mulf %61, %63 : vector<16x512xf32>
    %c0_34 = arith.constant 0 : index
    %c32 = arith.constant 32 : index
    %65 = vector.load %arg9[%c0_34, %c32] : memref<1x144xf32, #tpu.memory_space<vmem>>, vector<1x16xf32>
    %cst_35 = arith.constant dense<0.000000e+00> : vector<1x512xf32>
    %66 = tpu.matmul %65, %64, %cst_35 {dimension_numbers = #tpu.dot_dimension_numbers<[1], [0], [0], [1], [0, 0, 1, 1], [], []>} : vector<1x16xf32>, vector<16x512xf32>, vector<1x512xf32> -> vector<1x512xf32>
    %67 = arith.addf %60, %66 : vector<1x512xf32>
    %c1_i32_36 = arith.constant 1 : i32
    %68 = tpu.dynamic_rotate %45 by %c1_i32_36 dim 1 : vector<16x512xf32>, i32 -> vector<16x512xf32>
    %c3 = arith.constant 3 : index
    %c0_37 = arith.constant 0 : index
    %69 = vector.load %arg3[%c3, %c0_37] : memref<9x512xf32, #tpu.memory_space<vmem>>, vector<1x512xf32>
    %70 = vector.broadcast %69 : vector<1x512xf32> to vector<16x512xf32>
    %71 = arith.mulf %68, %70 : vector<16x512xf32>
    %c0_38 = arith.constant 0 : index
    %c48 = arith.constant 48 : index
    %72 = vector.load %arg9[%c0_38, %c48] : memref<1x144xf32, #tpu.memory_space<vmem>>, vector<1x16xf32>
    %cst_39 = arith.constant dense<0.000000e+00> : vector<1x512xf32>
    %73 = tpu.matmul %72, %71, %cst_39 {dimension_numbers = #tpu.dot_dimension_numbers<[1], [0], [0], [1], [0, 0, 1, 1], [], []>} : vector<1x16xf32>, vector<16x512xf32>, vector<1x512xf32> -> vector<1x512xf32>
    %74 = arith.addf %67, %73 : vector<1x512xf32>
    %c0_40 = arith.constant 0 : index
    %c64 = arith.constant 64 : index
    %75 = vector.load %arg9[%c0_40, %c64] : memref<1x144xf32, #tpu.memory_space<vmem>>, vector<1x16xf32>
    %cst_41 = arith.constant dense<0.000000e+00> : vector<1x512xf32>
    %76 = tpu.matmul %75, %45, %cst_41 {dimension_numbers = #tpu.dot_dimension_numbers<[1], [0], [0], [1], [0, 0, 1, 1], [], []>} : vector<1x16xf32>, vector<16x512xf32>, vector<1x512xf32> -> vector<1x512xf32>
    %77 = arith.addf %74, %76 : vector<1x512xf32>
    %c511_i32_42 = arith.constant 511 : i32
    %78 = tpu.dynamic_rotate %45 by %c511_i32_42 dim 1 : vector<16x512xf32>, i32 -> vector<16x512xf32>
    %c5 = arith.constant 5 : index
    %c0_43 = arith.constant 0 : index
    %79 = vector.load %arg3[%c5, %c0_43] : memref<9x512xf32, #tpu.memory_space<vmem>>, vector<1x512xf32>
    %80 = vector.broadcast %79 : vector<1x512xf32> to vector<16x512xf32>
    %81 = arith.mulf %78, %80 : vector<16x512xf32>
    %c0_44 = arith.constant 0 : index
    %c80 = arith.constant 80 : index
    %82 = vector.load %arg9[%c0_44, %c80] : memref<1x144xf32, #tpu.memory_space<vmem>>, vector<1x16xf32>
    %cst_45 = arith.constant dense<0.000000e+00> : vector<1x512xf32>
    %83 = tpu.matmul %82, %81, %cst_45 {dimension_numbers = #tpu.dot_dimension_numbers<[1], [0], [0], [1], [0, 0, 1, 1], [], []>} : vector<1x16xf32>, vector<16x512xf32>, vector<1x512xf32> -> vector<1x512xf32>
    %84 = arith.addf %77, %83 : vector<1x512xf32>
    %c497_i32_46 = arith.constant 497 : i32
    %85 = tpu.dynamic_rotate %45 by %c497_i32_46 dim 1 : vector<16x512xf32>, i32 -> vector<16x512xf32>
    %c6 = arith.constant 6 : index
    %c0_47 = arith.constant 0 : index
    %86 = vector.load %arg3[%c6, %c0_47] : memref<9x512xf32, #tpu.memory_space<vmem>>, vector<1x512xf32>
    %87 = vector.broadcast %86 : vector<1x512xf32> to vector<16x512xf32>
    %88 = arith.mulf %85, %87 : vector<16x512xf32>
    %c0_48 = arith.constant 0 : index
    %c96 = arith.constant 96 : index
    %89 = vector.load %arg9[%c0_48, %c96] : memref<1x144xf32, #tpu.memory_space<vmem>>, vector<1x16xf32>
    %cst_49 = arith.constant dense<0.000000e+00> : vector<1x512xf32>
    %90 = tpu.matmul %89, %88, %cst_49 {dimension_numbers = #tpu.dot_dimension_numbers<[1], [0], [0], [1], [0, 0, 1, 1], [], []>} : vector<1x16xf32>, vector<16x512xf32>, vector<1x512xf32> -> vector<1x512xf32>
    %91 = arith.addf %84, %90 : vector<1x512xf32>
    %c496_i32_50 = arith.constant 496 : i32
    %92 = tpu.dynamic_rotate %45 by %c496_i32_50 dim 1 : vector<16x512xf32>, i32 -> vector<16x512xf32>
    %c7 = arith.constant 7 : index
    %c0_51 = arith.constant 0 : index
    %93 = vector.load %arg3[%c7, %c0_51] : memref<9x512xf32, #tpu.memory_space<vmem>>, vector<1x512xf32>
    %94 = vector.broadcast %93 : vector<1x512xf32> to vector<16x512xf32>
    %95 = arith.mulf %92, %94 : vector<16x512xf32>
    %c0_52 = arith.constant 0 : index
    %c112 = arith.constant 112 : index
    %96 = vector.load %arg9[%c0_52, %c112] : memref<1x144xf32, #tpu.memory_space<vmem>>, vector<1x16xf32>
    %cst_53 = arith.constant dense<0.000000e+00> : vector<1x512xf32>
    %97 = tpu.matmul %96, %95, %cst_53 {dimension_numbers = #tpu.dot_dimension_numbers<[1], [0], [0], [1], [0, 0, 1, 1], [], []>} : vector<1x16xf32>, vector<16x512xf32>, vector<1x512xf32> -> vector<1x512xf32>
    %98 = arith.addf %91, %97 : vector<1x512xf32>
    %c495_i32_54 = arith.constant 495 : i32
    %99 = tpu.dynamic_rotate %45 by %c495_i32_54 dim 1 : vector<16x512xf32>, i32 -> vector<16x512xf32>
    %c8 = arith.constant 8 : index
    %c0_55 = arith.constant 0 : index
    %100 = vector.load %arg3[%c8, %c0_55] : memref<9x512xf32, #tpu.memory_space<vmem>>, vector<1x512xf32>
    %101 = vector.broadcast %100 : vector<1x512xf32> to vector<16x512xf32>
    %102 = arith.mulf %99, %101 : vector<16x512xf32>
    %c0_56 = arith.constant 0 : index
    %c128 = arith.constant 128 : index
    %103 = vector.load %arg9[%c0_56, %c128] : memref<1x144xf32, #tpu.memory_space<vmem>>, vector<1x16xf32>
    %cst_57 = arith.constant dense<0.000000e+00> : vector<1x512xf32>
    %104 = tpu.matmul %103, %102, %cst_57 {dimension_numbers = #tpu.dot_dimension_numbers<[1], [0], [0], [1], [0, 0, 1, 1], [], []>} : vector<1x16xf32>, vector<16x512xf32>, vector<1x512xf32> -> vector<1x512xf32>
    %105 = arith.addf %98, %104 : vector<1x512xf32>
    %c0_58 = arith.constant 0 : index
    %c0_59 = arith.constant 0 : index
    %106 = vector.load %arg10[%c0_58, %c0_59] : memref<1x1xf32, #tpu.memory_space<vmem>>, vector<1x1xf32>
    %107 = vector.broadcast %106 : vector<1x1xf32> to vector<1x512xf32>
    %108 = arith.addf %105, %107 : vector<1x512xf32>
    %cst_60 = arith.constant 0.000000e+00 : f32
    %109 = vector.broadcast %cst_60 : f32 to vector<1x512xf32>
    %110 = arith.maximumf %108, %109 : vector<1x512xf32>
    %c0_61 = arith.constant 0 : index
    %c0_62 = arith.constant 0 : index
    %111 = vector.load %arg11[%c0_61, %c0_62] : memref<1x512xf32, #tpu.memory_space<vmem>>, vector<1x512xf32>
    tpu.vector_store %arg11[%c0_61, %c0_62], %110 {strides = array<i32>} : memref<1x512xf32, #tpu.memory_space<vmem>>, vector<1x512xf32>,
    return
  }
  func.func @transform_0(%arg0: i32) -> i32 {
    %c0_i32 = arith.constant 0 : i32
    %c0_i32_0 = arith.constant 0 : i32
    return %c0_i32 : i32
  }
  func.func @transform_1(%arg0: i32) -> (i32, i32) {
    %c0_i32 = arith.constant 0 : i32
    %c0_i32_0 = arith.constant 0 : i32
    %c0_i32_1 = arith.constant 0 : i32
    return %c0_i32, %c0_i32_0 : i32, i32
  }
  func.func @transform_2(%arg0: i32) -> (i32, i32) {
    %c0_i32 = arith.constant 0 : i32
    %c0_i32_0 = arith.constant 0 : i32
    %c0_i32_1 = arith.constant 0 : i32
    return %c0_i32, %c0_i32_0 : i32, i32
  }
  func.func @transform_3(%arg0: i32) -> (i32, i32) {
    %c0_i32 = arith.constant 0 : i32
    %c0_i32_0 = arith.constant 0 : i32
    %c0_i32_1 = arith.constant 0 : i32
    return %c0_i32, %c0_i32_0 : i32, i32
  }
  func.func @transform_4(%arg0: i32) -> (i32, i32) {
    %c0_i32 = arith.constant 0 : i32
    %c0_i32_0 = arith.constant 0 : i32
    %c0_i32_1 = arith.constant 0 : i32
    return %c0_i32, %c0_i32_0 : i32, i32
  }
  func.func @transform_5(%arg0: i32) -> (i32, i32) {
    %c0_i32 = arith.constant 0 : i32
    %c0_i32_0 = arith.constant 0 : i32
    %c0_i32_1 = arith.constant 0 : i32
    return %c0_i32, %c0_i32_0 : i32, i32
  }
  func.func @transform_6(%arg0: i32) -> (i32, i32) {
    %c0_i32 = arith.constant 0 : i32
    %c0_i32_0 = arith.constant 0 : i32
    %c0_i32_1 = arith.constant 0 : i32
    return %c0_i32, %c0_i32_0 : i32, i32
  }
  func.func @transform_7(%arg0: i32) -> (i32, i32) {
    %c0_i32 = arith.constant 0 : i32
    %c0_i32_0 = arith.constant 0 : i32
    %c0_i32_1 = arith.constant 0 : i32
    return %c0_i32, %c0_i32_0 : i32, i32
  }
  func.func @transform_8(%arg0: i32) -> (i32, i32) {
    %c0_i32 = arith.constant 0 : i32
    %c0_i32_0 = arith.constant 0 : i32
    %c0_i32_1 = arith.constant 0 : i32
    return %c0_i32, %c0_i32_0 : i32, i32
  }
  func.func @transform_9(%arg0: i32) -> (i32, i32) {
    %c0_i32 = arith.constant 0 : i32
    %c0_i32_0 = arith.constant 0 : i32
    %c0_i32_1 = arith.constant 0 : i32
    return %c0_i32, %c0_i32_0 : i32, i32
  }
  func.func @transform_10(%arg0: i32) -> (i32, i32) {
    %c0_i32 = arith.constant 0 : i32
    %c0_i32_0 = arith.constant 0 : i32
    %c0_i32_1 = arith.constant 0 : i32
    return %c0_i32, %c0_i32_0 : i32, i32
  }
}

</mosaic_0001>

<bundles_post_ra>
// kernel: tpu_custom_call.1
= control target key start
LH: loop header
LB: loop body
LE: loop exit
PB: predicated region body
PF: predicated region fallthrough
CT: control target
= control target key end

     0   :  { %s3031_s0 = inlined_call_operand.<no memory space> [shape: f32[1], index: 0, kind: input, shape index: {}]   ;;  %s3032_s1 = inlined_call_operand.vmem [shape: f32[1,512], index: 1, kind: input, shape index: {}]   ;;  %s3033_s2 = inlined_call_operand.hbm [shape: f32[9,512], index: 2, kind: input, shape index: {}]   ;;  %s3034_s3 = inlined_call_operand.vmem [shape: f32[16,9], index: 3, kind: input, shape index: {}]   ;;  %s3035_s4 = inlined_call_operand.vmem [shape: f32[16,9], index: 4, kind: input, shape index: {}]   ;;  %s3036_s5 = inlined_call_operand.vmem [shape: f32[16,1], index: 5, kind: input, shape index: {}]   ;;  %s3037_s6 = inlined_call_operand.vmem [shape: f32[16,1], index: 6, kind: input, shape index: {}]   ;;  %s3038_s7 = inlined_call_operand.vmem [shape: f32[16,1], index: 7, kind: input, shape index: {}]   ;;  %s3039_s8 = inlined_call_operand.vmem [shape: f32[1,144], index: 8, kind: input, shape index: {}]   ;;  %s3040_s9 = inlined_call_operand.<no memory space> [shape: f32[1,1], index: 9, kind: input, shape index: {}]   ;;  %s3041_s10 = inlined_call_operand.hbm [shape: f32[1,512], index: 10, kind: output, shape index: {}]  }
   0x1   :  { %v16_v0 = vstv %s3040_s9 }
   0x2   :  { %17 = vst [vmem:[#allocation3] sm:$0x1] %v16_v0 }
   0x3   :  { %18 = vsyncpa [#allocation5], 0 }
   0x4   :  { %19 = vsyncpa [#allocation6], 0  ;;  %s28_s17 = sshll.u32 %s3033_s2, 4  ;;  %s1970_s18 = smov [#allocation4]   ;;  %s29_s17 = int_to_ptr.hbm [resolvable:$true] %s28_s17 }
   0x5   :  { %s30_s19 = sshll.u32 %s1970_s18, 4  ;;  %s1971_s20 = smov 512   ;;  %s31_s19 = int_to_ptr.vmem [resolvable:$true] %s30_s19 }
   0x6   :  { %s1972_s21 = smov 32  }
   0x7   :  { %36 = dma.hbm_to_vmem [thread:$0]  %s29_s17, 1024, %s31_s19, [#allocation5], %s1971_s20, %s1971_s20, %s1972_s21  }
   0x8   :  { %1966 = dma.done.wait [#allocation5], 1024  }
   0x9   :  { %1967 = vsyncadd [#allocation5], 4294966272  ;;  %v63_v1 = vld [vmem:[%s3032_s1] sm:$0xf]  ;;  %s1973_s9 = smov 17   ;;  %s1974_s2 = smov 15   ;;  %v299_v19 = vstv %s3031_s0  ;;  %v3042_v32 = vlaneseq }
   0xa   :  { %v2052_v2 = vperm.slane %v63_v1, 1  ;;  %s1975_s24 = smov 16   ;;  %v2060_v3 = vperm.slane %v63_v1, 2  ;;  %v2068_v4 = vperm.slane %v63_v1, 3  ;;  %s1976_s1 = smov 1   ;;  %v2076_v5 = vperm.slane %v63_v1, 0 }
   0xb   :  { %s1977_s25 = smov 127   ;;  %s1978_s26 = smov 113   ;;  %vm251_vm0 = vcmask 1040384   ;;  %v2144_v17 = vld [vmem:[#allocation4 + $0x30] sm:$0x1]  ;;  %v297_v18 = vld [vmem:[%s3034_s3] sm:$0xff] }
   0xc   :  { %75 = vrot.lane.b32.xlu2 %v2052_v2, %s1973_s9  ;;  %103 = vrot.lane.b32.xlu1 %v2052_v2, %s1974_s2  ;;  %s1979_s27 = smov 112   ;;  %s1980_s28 = smov 111   ;;  %v2154_v20 = vld [vmem:[#allocation4 + $0x10] sm:$0xff]  ;;  %v300_v21 = vmul.f32 %v299_v19, %v297_v18  ;;  %vm302_vm1 = vcmask 72704   ;;  %v2164_v25 = vld [vmem:[#allocation4 + $0x38] sm:$0x1] }
   0xd   :  { %90 = vrot.lane.b32.xlu0 %v2052_v2, %s1975_s24  ;;  %1839 = vmatpush.msk.msra.mxu2 %vm251_vm0, %v2144_v17  ;;  %v2166_v26 = vld [vmem:[#allocation4 + $0x18] sm:$0xff]  ;;  %v298_v27 = vld [vmem:[%s3034_s3 + $0x8] sm:$0xff]  ;;  %v2182_v33 = vld [vmem:[#allocation4 + $0x20] sm:$0x1]  ;;  %v2191_v35 = vand.u32 127, %v3042_v32  ;;  %vm256_vm6 = vcmask 1041408  }
   0xe   :  { %1842 = vmatpush.msk.msra.mxu3 %vm251_vm0, %v2164_v25  ;;  %v301_v28 = vmul.f32 %v299_v19, %v298_v27  ;;  %v2184_v34 = vld [vmem:[#allocation4 + $0x28] sm:$0x1]  ;;  %1833 = vmatpush.msk.msra.mxu0 %vm251_vm0, %v2182_v33  ;;  %v2193_v36 = vld [vmem:[#allocation4] sm:$0xff]  ;;  %vm261_vm9 = vcmask 1042432   ;;  %vm266_vm11 = vcmask 1043456   ;;  %vm271_vm12 = vcmask 1044480  }
   0xf   :  { %382 = vmatpush.msra.mxu2 %v2154_v20  ;;  %1836 = vmatpush.msk.msra.mxu1 %vm251_vm0, %v2184_v34  ;;  %v2195_v37 = vld [vmem:[#allocation4 + $0x8] sm:$0xff]  ;;  %vm96_vm2 = vcmp.lt.s32.totalorder %v2191_v35, 16  ;;  %vm109_vm3 = vcmp.lt.s32.totalorder %v2191_v35, 15  ;;  %vm83_vm4 = vcmp.lt.s32.totalorder %v2191_v35, 17  ;;  %vm122_vm5 = vcmp.lt.s32.totalorder %v2191_v35, 1  ;;  %v523_v1 = vld [vmem:[%s3036_s5] sm:$0xff] }
  0x10   :  { %1840 = vmatmul.msk.f32.vlgmr.msra.gmra.mxu2 %vm302_vm1, %v300_v21  ;;  %405 = vmatpush.msra.mxu3 %v2166_v26  ;;  %vm135_vm7 = vcmp.lt.s32.totalorder %v2191_v35, 127  ;;  %vm161_vm8 = vcmp.lt.s32.totalorder %v2191_v35, 112  ;;  %vm148_vm10 = vcmp.lt.s32.totalorder %v2191_v35, 113  ;;  %vm174_vm13 = vcmp.lt.s32.totalorder %v2191_v35, 111  ;;  %s1982_s30 = smov 64   ;;  %s1983_s11 = smov 96  }
  0x11   :  { %1843 = vmatmul.msk.f32.vlgmr.msra.gmra.mxu3 %vm302_vm1, %v300_v21  ;;  %336 = vmatpush.msra.mxu0 %v2193_v36  ;;  %vm281_vm14 = vcmask 1046528   ;;  %vm276_vm15 = vcmask 1045504   ;;  %s1984_s12 = smov 80   ;;  %s1985_s0 = smov 48  }
  0x12   :  { %359 = vmatpush.msra.mxu1 %v2195_v37  ;;  %1834 = vmatmul.msk.f32.vlgmr.msra.gmra.mxu0 %vm302_vm1, %v300_v21 }
  0x13   :  { %1837 = vmatmul.msk.f32.vlgmr.msra.gmra.mxu1 %vm302_vm1, %v300_v21 }
  0x14   :  { %77 = vrot.lane.b32.xlu2 %v2060_v3, %s1973_s9  ;;  %105 = vrot.lane.b32.xlu1 %v2060_v3, %s1974_s2 }
  0x15   :  { %92 = vrot.lane.b32.xlu0 %v2060_v3, %s1975_s24 }
  0x18   :  { %1841 = vmatmul.msk.f32.gmra.mxu2 %vm302_vm1, %v301_v28 }
  0x19   :  { %1844 = vmatmul.msk.f32.gmra.mxu3 %vm302_vm1, %v301_v28 }
  0x1a   :  { %1835 = vmatmul.msk.f32.gmra.mxu0 %vm302_vm1, %v301_v28 }
  0x1b   :  { %1838 = vmatmul.msk.f32.gmra.mxu1 %vm302_vm1, %v301_v28 }
  0x1c   :  { %118 = vrot.lane.b32.xlu2 %v2060_v3, %s1976_s1  ;;  %116 = vrot.lane.b32.xlu1 %v2052_v2, %s1976_s1 }
  0x1d   :  { %94 = vrot.lane.b32.xlu0 %v2068_v4, %s1975_s24 }
  0x24   :  { %79 = vrot.lane.b32.xlu1 %v2068_v4, %s1973_s9  ;;  %88 = vrot.lane.b32.xlu2 %v2076_v5, %s1975_s24 }
  0x25   :  { %107 = vrot.lane.b32.xlu0 %v2068_v4, %s1974_s2 }
  0x2c   :  { %131 = vrot.lane.b32.xlu1 %v2060_v3, %s1977_s25  ;;  %133 = vrot.lane.b32.xlu2 %v2068_v4, %s1977_s25 }
  0x2d   :  { %120 = vrot.lane.b32.xlu0 %v2068_v4, %s1976_s1 }
  0x34   :  { %144 = vrot.lane.b32.xlu1 %v2060_v3, %s1978_s26  ;;  %146 = vrot.lane.b32.xlu2 %v2068_v4, %s1978_s26 }
  0x35   :  { %101 = vrot.lane.b32.xlu0 %v2076_v5, %s1974_s2 }
  0x3c   :  { %114 = vrot.lane.b32.xlu1 %v2076_v5, %s1976_s1  ;;  %127 = vrot.lane.b32.xlu2 %v2076_v5, %s1977_s25 }
  0x3d   :  { %73 = vrot.lane.b32.xlu0 %v2076_v5, %s1973_s9 }
  0x44   :  { %159 = vrot.lane.b32.xlu1 %v2068_v4, %s1979_s27  ;;  %140 = vrot.lane.b32.xlu2 %v2076_v5, %s1978_s26 }
  0x45   :  { %157 = vrot.lane.b32.xlu0 %v2060_v3, %s1979_s27 }
  0x4c   :  { %172 = vrot.lane.b32.xlu1 %v2068_v4, %s1980_s28  ;;  %129 = vrot.lane.b32.xlu2 %v2052_v2, %s1977_s25 }
  0x4d   :  { %170 = vrot.lane.b32.xlu0 %v2060_v3, %s1980_s28 }
  0x54   :  { %142 = vrot.lane.b32.xlu1 %v2052_v2, %s1978_s26  ;;  %166 = vrot.lane.b32.xlu2 %v2076_v5, %s1980_s28 }
  0x55   :  { %153 = vrot.lane.b32.xlu0 %v2076_v5, %s1979_s27 }
  0x5c   :  { %168 = vrot.lane.b32.xlu1 %v2052_v2, %s1980_s28 }
  0x5d   :  { %155 = vrot.lane.b32.xlu0 %v2052_v2, %s1979_s27 }
  0x66   :  { %v2124_v6 = vpop.permute.xlu2 %75 }
  0x6e   :  { %v2126_v7 = vpop.permute.xlu2 %77 }
  0x6f   :  { %v85_v55 = vsel %vm83_vm4, %v2124_v6, %v2126_v7 }
  0x76   :  { %v2128_v8 = vpop.permute.xlu2 %118 }
  0x7e   :  { %v2130_v9 = vpop.permute.xlu1 %103  ;;  %v2132_v11 = vpop.permute.xlu2 %88 }
  0x7f   :  { %v91_v10 = vpop.permute.xlu0 %90 }
  0x80   :  { %v99_v41 = vsel %vm96_vm2, %v2132_v11, %v91_v10 }
  0x81   :  { %v184_v44 = vrot.slane %v99_v41, 7 }
  0x86   :  { %v2134_v12 = vpop.permute.xlu1 %105  ;;  %v2138_v14 = vpop.permute.xlu2 %133 }
  0x87   :  { %v2136_v13 = vpop.permute.xlu0 %92  ;;  %v111_v50 = vsel %vm109_vm3, %v2130_v9, %v2134_v12 }
  0x88   :  { %v98_v45 = vsel %vm96_vm2, %v91_v10, %v2136_v13  ;;  %v197_v56 = vrot.slane %v111_v50, 6 }
  0x89   :  { %v185_v51 = vrot.slane %v98_v45, 7 }
  0x8b   :  { %v254_v57 = vsel %vm251_vm0, %v85_v55, %v185_v51  ;;  %v635_v55 = vld [vmem:[%s3038_s7] sm:$0xff] }
  0x8e   :  { %v2140_v15 = vpop.permute.xlu1 %116  ;;  %v2157_v22 = vpop.permute.xlu2 %146 }
  0x8f   :  { %v2142_v16 = vpop.permute.xlu0 %94  ;;  %v124_v53 = vsel %vm122_vm5, %v2140_v15, %v2128_v8 }
  0x90   :  { %v209_v58 = vrot.slane %v124_v53, 5  ;;  %v97_v60 = vsel %vm96_vm2, %v2136_v13, %v2142_v16 }
  0x91   :  { %v186_v18 = vrot.slane %v97_v60, 7 }
  0x96   :  { %v2159_v23 = vpop.permute.xlu1 %79  ;;  %v2180_v31 = vpop.permute.xlu2 %127 }
  0x97   :  { %v2162_v24 = vpop.permute.xlu0 %107  ;;  %v139_v50 = vsel %vm135_vm7, %v2138_v14, %v2180_v31 }
  0x98   :  { %v110_v63 = vsel %vm109_vm3, %v2134_v12, %v2162_v24  ;;  %v1981_v12 = vmov 0  }
  0x99   :  { %1911 = vset.pattern.permute.xlu0 %v1981_v12  ;;  %1910 = vset.pattern.permute.xlu2 %v1981_v12 }
  0x9a   :  { %527 = vperm.xlu0 %1911, %v523_v1   ;;  %1912 = vset.pattern.permute.xlu1 %v1981_v12 }
  0x9b   :  { %639 = vperm.xlu1 %1912, %v635_v55  }
  0x9e   :  { %v2175_v29 = vpop.permute.xlu1 %131  ;;  %v2207_v40 = vpop.permute.xlu2 %140 }
  0x9f   :  { %v2178_v30 = vpop.permute.xlu0 %120  ;;  %v136_v61 = vsel %vm135_vm7, %v2175_v29, %v2138_v14  ;;  %v152_v1 = vsel %vm148_vm10, %v2157_v22, %v2207_v40 }
  0xa0   :  { %v221_v19 = vrot.slane %v136_v61, 3  ;;  %v123_v21 = vsel %vm122_vm5, %v2128_v8, %v2178_v30  ;;  %v100_v8 = vsel %vm96_vm2, %v2142_v16, %v2132_v11  ;;  %v636_v11 = vld [vmem:[%s3038_s7 + $0x8] sm:$0xff] }
  0xa1   :  { %v210_v45 = vrot.slane %v123_v21, 5  ;;  %v524_v16 = vld [vmem:[%s3036_s5 + $0x8] sm:$0xff] }
  0xa2   :  { %532 = vperm.xlu2 %1910, %v524_v16   ;;  %644 = vperm.xlu0 %1911, %v636_v11  }
  0xa6   :  { %v2198_v38 = vpop.permute.xlu1 %144  ;;  %v2245_v54 = vpop.permute.xlu2 %129 }
  0xa7   :  { %v2202_v39 = vpop.permute.xlu0 %101  ;;  %v149_v0 = vsel %vm148_vm10, %v2198_v38, %v2157_v22 }
  0xa8   :  { %v112_v42 = vsel %vm109_vm3, %v2202_v39, %v2130_v9  ;;  %v84_v9 = vsel %vm83_vm4, %v2126_v7, %v2159_v23  ;;  %v198_v7 = vrot.slane %v110_v63, 6  ;;  %v233_v27 = vrot.slane %v149_v0, 2 }
  0xa9   :  { %v196_v47 = vrot.slane %v112_v42, 6  ;;  %v255_v28 = vsel %vm251_vm0, %v84_v9, %v186_v18  ;;  %v183_v63 = vrot.slane %v100_v8, 7  ;;  %v113_v0 = vsel %vm109_vm3, %v2162_v24, %v2202_v39  ;;  %v295_v24 = vld [vmem:[%s3035_s4] sm:$0xff] }
  0xae   :  { %v2217_v43 = vpop.permute.xlu1 %114  ;;  %v2293_v42 = vpop.permute.xlu2 %166 }
  0xaf   :  { %v2223_v46 = vpop.permute.xlu0 %73  ;;  %v125_v22 = vsel %vm122_vm5, %v2217_v43, %v2140_v15 }
  0xb0   :  { %v86_v48 = vsel %vm83_vm4, %v2223_v46, %v2124_v6  ;;  %v259_v6 = vsel %vm256_vm6, %v254_v57, %v197_v56  ;;  %v87_v60 = vsel %vm83_vm4, %v2159_v23, %v2223_v46 }
  0xb1   :  { %v253_v49 = vsel %vm251_vm0, %v86_v48, %v184_v44  ;;  %v264_v13 = vsel %vm261_vm9, %v259_v6, %v209_v58  ;;  %v252_v46 = vsel %vm251_vm0, %v87_v60, %v183_v63  ;;  %v195_v6 = vrot.slane %v113_v0, 6 }
  0xb2   :  { %v2238_v52 = vsel %vm256_vm6, %v253_v49, %v196_v47  ;;  %v269_v44 = vsel %vm266_vm11, %v264_v13, %v2060_v3  ;;  %v260_v49 = vsel %vm256_vm6, %v255_v28, %v198_v7 }
  0xb3   :  { %v274_v47 = vsel %vm271_vm12, %v269_v44, %v221_v19  ;;  %v265_v58 = vsel %vm261_vm9, %v260_v49, %v210_v45  ;;  %v257_v12 = vsel %vm256_vm6, %v252_v46, %v195_v6 }
  0xb4   :  { %v279_v53 = vsel %vm276_vm15, %v274_v47, %v233_v27  ;;  %v270_v39 = vsel %vm266_vm11, %v265_v58, %v2068_v4  ;;  %v361_v58 = vpop.f32.mrf.mxu1 }
  0xb6   :  { %v2252_v59 = vpop.permute.xlu1 %159 }
  0xb7   :  { %v2264_v62 = vpop.permute.xlu0 %157 }
  0xb8   :  { %v162_v10 = vsel %vm161_vm8, %v2264_v62, %v2252_v59 }
  0xb9   :  { %v245_v41 = vrot.slane %v162_v10, 1 }
  0xbb   :  { %v284_v57 = vsel %vm281_vm14, %v279_v53, %v245_v41  ;;  %v137_v41 = vsel %vm135_vm7, %v2245_v54, %v2175_v29 }
  0xbc   :  { %v288_v23 = vmul.f32 %v284_v57, %v2154_v20  ;;  %v208_v20 = vrot.slane %v125_v22, 5  ;;  %v338_v57 = vpop.f32.mrf.mxu0  ;;  %v364_v63 = vpop.f32.mrf.mxu1 }
  0xbe   :  { %v173_v48 = vpop.permute.xlu1 %172  ;;  %v263_v7 = vsel %vm261_vm9, %v2238_v52, %v208_v20 }
  0xbf   :  { %v171_v51 = vpop.permute.xlu0 %170  ;;  %v178_v3 = vsel %vm174_vm13, %v173_v48, %v2293_v42  ;;  %v268_v47 = vsel %vm266_vm11, %v263_v7, %v2052_v2 }
  0xc0   :  { %v175_v14 = vsel %vm174_vm13, %v171_v51, %v173_v48  ;;  %v293_v56 = vmul.f32 %v178_v3, %v2164_v25  ;;  %v222_v25 = vrot.slane %v139_v50, 3  ;;  %v220_v48 = vrot.slane %v137_v41, 3 }
  0xc1   :  { %v292_v61 = vmul.f32 %v175_v14, %v2144_v17  ;;  %v126_v17 = vsel %vm122_vm5, %v2178_v30, %v2217_v43  ;;  %v234_v30 = vrot.slane %v152_v1, 2  ;;  %v138_v43 = vsel %vm135_vm7, %v2180_v31, %v2245_v54  ;;  %v296_v31 = vld [vmem:[%s3035_s4 + $0x8] sm:$0xff]  ;;  %v384_v14 = vpop.f32.mrf.mxu2 }
  0xc2   :  { %1854 = vmatpush.msk.msrb.mxu3 %vm251_vm0, %v293_v56  ;;  %v207_v9 = vrot.slane %v126_v17, 5  ;;  %v275_v4 = vsel %vm271_vm12, %v270_v39, %v222_v25  ;;  %v219_v44 = vrot.slane %v138_v43, 3  ;;  %v407_v56 = vpop.f32.mrf.mxu3 }
  0xc3   :  { %1851 = vmatpush.msk.msrb.mxu2 %vm251_vm0, %v292_v61  ;;  %v280_v21 = vsel %vm276_vm15, %v275_v4, %v234_v30 }
  0xc4   :  { %v262_v19 = vsel %vm261_vm9, %v257_v12, %v207_v9  ;;  %v341_v61 = vpop.f32.mrf.mxu0 }
  0xc5   :  { %492 = vmatpush.msrb.mxu2 %v288_v23 }
  0xc6   :  { %v143_v10 = vpop.permute.xlu1 %142  ;;  %1852 = vmatmul.msk.f32.vlgmr.msrb.gmra.mxu2 %vm302_vm1, %v295_v24 }
  0xc7   :  { %v154_v13 = vpop.permute.xlu0 %153  ;;  %v150_v27 = vsel %vm148_vm10, %v143_v10, %v2198_v38 }
  0xc8   :  { %v165_v18 = vsel %vm161_vm8, %v2252_v59, %v154_v13  ;;  %v151_v59 = vsel %vm148_vm10, %v2207_v40, %v143_v10  ;;  %v232_v38 = vrot.slane %v150_v27, 2  ;;  %v267_v40 = vsel %vm266_vm11, %v262_v19, %v2076_v5 }
  0xc9   :  { %v246_v15 = vrot.slane %v165_v18, 1  ;;  %v231_v45 = vrot.slane %v151_v59, 2  ;;  %v272_v53 = vsel %vm271_vm12, %v267_v40, %v219_v44  ;;  %v387_v60 = vpop.f32.mrf.mxu2 }
  0xcb   :  { %v285_v28 = vsel %vm281_vm14, %v280_v21, %v246_v15 }
  0xcc   :  { %v289_v52 = vmul.f32 %v285_v28, %v2166_v26 }
  0xce   :  { %515 = vmatpush.msrb.mxu3 %v289_v52  ;;  %v169_v8 = vpop.permute.xlu1 %168  ;;  %1853 = vmatmul.msk.f32.gmra.mxu2 %vm302_vm1, %v296_v31 }
  0xcf   :  { %v176_v49 = vsel %vm174_vm13, %v169_v8, %v171_v51  ;;  %v177_v26 = vsel %vm174_vm13, %v2293_v42, %v169_v8  ;;  %v156_v29 = vpop.permute.xlu0 %155  ;;  %1855 = vmatmul.msk.f32.vlgmr.msrb.gmra.mxu3 %vm302_vm1, %v295_v24  ;;  %v273_v42 = vsel %vm271_vm12, %v268_v47, %v220_v48 }
  0xd0   :  { %v290_v54 = vmul.f32 %v177_v26, %v2182_v33  ;;  %v291_v50 = vmul.f32 %v176_v49, %v2184_v34  ;;  %v163_v5 = vsel %vm161_vm8, %v156_v29, %v2264_v62  ;;  %v164_v2 = vsel %vm161_vm8, %v154_v13, %v156_v29 }
  0xd1   :  { %v243_v3 = vrot.slane %v164_v2, 1  ;;  %v244_v51 = vrot.slane %v163_v5, 1  ;;  %v277_v33 = vsel %vm276_vm15, %v272_v53, %v231_v45  ;;  %v278_v34 = vsel %vm276_vm15, %v273_v42, %v232_v38 }
  0xd2   :  { %1845 = vmatpush.msk.msrb.mxu0 %vm251_vm0, %v290_v54  ;;  %1848 = vmatpush.msk.msrb.mxu1 %vm251_vm0, %v291_v50 }
  0xd3   :  { %v282_v11 = vsel %vm281_vm14, %v277_v33, %v243_v3  ;;  %v283_v62 = vsel %vm281_vm14, %v278_v34, %v244_v51 }
  0xd4   :  { %v286_v16 = vmul.f32 %v282_v11, %v2193_v36  ;;  %v287_v55 = vmul.f32 %v283_v62, %v2195_v37  ;;  %v410_v36 = vpop.f32.mrf.mxu3  ;;  %v2420_v37 = vld [vmem:[%s3039_s8] ss:$0 sm:$0xff] }
  0xd5   :  { %1172 = vrot.lane.b32.xlu0 %v2420_v37, %s1982_s30 }
  0xd6   :  { %446 = vmatpush.msrb.mxu0 %v286_v16  ;;  %469 = vmatpush.msrb.mxu1 %v287_v55 }
  0xd7   :  { %1846 = vmatmul.msk.f32.vlgmr.msrb.gmra.mxu0 %vm302_vm1, %v295_v24  ;;  %1849 = vmatmul.msk.f32.vlgmr.msrb.gmra.mxu1 %vm302_vm1, %v295_v24 }
  0xd8   :  { %1856 = vmatmul.msk.f32.gmra.mxu3 %vm302_vm1, %v296_v31 }
  0xdf   :  { %1847 = vmatmul.msk.f32.gmra.mxu0 %vm302_vm1, %v296_v31  ;;  %1850 = vmatmul.msk.f32.gmra.mxu1 %vm302_vm1, %v296_v31 }
  0xfc   :  { %v533_v15 = vpop.permute.xlu2 %532 }
 0x10c   :  { %v528_v17 = vpop.permute.xlu0 %527 }
 0x10d   :  { %v2427_v50 = vpop.permute.xlu1 %639 }
 0x149   :  { %v494_v0 = vpop.f32.mrf.mxu2 }
 0x14a   :  { %v495_v1 = vadd.f32 %v494_v0, %v384_v14 }
 0x14c   :  { %v537_v6 = vadd.f32 %v528_v17, %v495_v1 }
 0x14e   :  { %v545_v19 = vmax.f32 %v537_v6, 0.0 }
 0x151   :  { %v497_v20 = vpop.f32.mrf.mxu2 }
 0x152   :  { %v517_v25 = vpop.f32.mrf.mxu3  ;;  %v498_v18 = vadd.f32 %v497_v20, %v387_v60 }
 0x153   :  { %v518_v23 = vadd.f32 %v517_v25, %v407_v56 }
 0x154   :  { %v448_v24 = vpop.f32.mrf.mxu0  ;;  %v471_v39 = vpop.f32.mrf.mxu1  ;;  %v541_v52 = vadd.f32 %v533_v15, %v498_v18 }
 0x155   :  { %v449_v22 = vadd.f32 %v448_v24, %v338_v57  ;;  %v472_v46 = vadd.f32 %v471_v39, %v361_v58  ;;  %v538_v10 = vadd.f32 %v528_v17, %v518_v23 }
 0x156   :  { %v549_v49 = vmax.f32 %v541_v52, 0.0 }
 0x157   :  { %v535_v30 = vadd.f32 %v528_v17, %v449_v22  ;;  %v536_v9 = vadd.f32 %v528_v17, %v472_v46  ;;  %v546_v21 = vmax.f32 %v538_v10, 0.0  ;;  %v2468_v22 = vpop.permute.xlu0 %644 }
 0x159   :  { %v543_v12 = vmax.f32 %v535_v30, 0.0  ;;  %v544_v13 = vmax.f32 %v536_v9, 0.0 }
 0x15b   :  { %v551_v4 = vadd.f32 %v544_v13, %v543_v12  ;;  %v520_v43 = vpop.f32.mrf.mxu3 }
 0x15c   :  { %v451_v7 = vpop.f32.mrf.mxu0  ;;  %v474_v27 = vpop.f32.mrf.mxu1  ;;  %v521_v59 = vadd.f32 %v520_v43, %v410_v36 }
 0x15d   :  { %v452_v28 = vadd.f32 %v451_v7, %v341_v61  ;;  %v475_v31 = vadd.f32 %v474_v27, %v364_v63  ;;  %v552_v41 = vadd.f32 %v551_v4, %v545_v19  ;;  %v613_v27 = vld [vmem:[%s3037_s6] sm:$0xff] }
 0x15e   :  { %v542_v8 = vadd.f32 %v533_v15, %v521_v59 }
 0x15f   :  { %v539_v44 = vadd.f32 %v533_v15, %v452_v28  ;;  %v540_v45 = vadd.f32 %v533_v15, %v475_v31  ;;  %v553_v38 = vadd.f32 %v552_v41, %v546_v21  ;;  %v2472_v6 = vpop.permute.xlu0 %1172 }
 0x160   :  { %v550_v26 = vmax.f32 %v542_v8, 0.0 }
 0x161   :  { %v547_v40 = vmax.f32 %v539_v44, 0.0  ;;  %v548_v47 = vmax.f32 %v540_v45, 0.0  ;;  %554 = vadd.xlane.f32.xlu2 %v553_v38  ;;  %v614_v45 = vld [vmem:[%s3037_s6 + $0x8] sm:$0xff] }
 0x163   :  { %v556_v48 = vadd.f32 %v548_v47, %v547_v40 }
 0x165   :  { %v557_v29 = vadd.f32 %v556_v48, %v549_v49 }
 0x167   :  { %v558_v54 = vadd.f32 %v557_v29, %v550_v26 }
 0x169   :  { %559 = vadd.xlane.f32.xlu1 %v558_v54 }
 0x179   :  { %953 = vrot.lane.b32.xlu2 %v2420_v37, %s1983_s11 }
 0x181   :  { %1084 = vrot.lane.b32.xlu2 %v2420_v37, %s1984_s12 }
 0x182   :  { %743 = vrot.lane.b32.xlu1 %v2420_v37, %s1979_s27 }
 0x18a   :  { %1303 = vrot.lane.b32.xlu1 %v2420_v37, %s1985_s0 }
 0x192   :  { %1434 = vrot.lane.b32.xlu1 %v2420_v37, %s1972_s21 }
 0x19a   :  { %1565 = vrot.lane.b32.xlu1 %v2420_v37, %s1975_s24 }
 0x1d4   :  { %v555_v5 = vpop.xlane.xlu2 %554 }
 0x1d5   :  { %v561_v2 = vmul.f32 0.001953125, %v555_v5 }
 0x1d7   :  { %v2429_v3 = vsub.f32 %v543_v12, %v561_v2  ;;  %v2431_v51 = vsub.f32 %v544_v13, %v561_v2  ;;  %v2433_v53 = vsub.f32 %v545_v19, %v561_v2  ;;  %v2435_v42 = vsub.f32 %v546_v21, %v561_v2 }
 0x1d9   :  { %v571_v33 = vmul.f32 %v2429_v3, %v2429_v3  ;;  %v572_v34 = vmul.f32 %v2431_v51, %v2431_v51  ;;  %v573_v11 = vmul.f32 %v2433_v53, %v2433_v53  ;;  %v574_v14 = vmul.f32 %v2435_v42, %v2435_v42 }
 0x1db   :  { %v579_v62 = vadd.f32 %v572_v34, %v571_v33 }
 0x1dc   :  { %v560_v16 = vpop.xlane.xlu1 %559  ;;  %v2466_v39 = vpop.permute.xlu2 %953 }
 0x1dd   :  { %v562_v55 = vmul.f32 0.001953125, %v560_v16  ;;  %v580_v56 = vadd.f32 %v579_v62, %v573_v11 }
 0x1df   :  { %v2446_v57 = vsub.f32 %v547_v40, %v562_v55  ;;  %v2448_v58 = vsub.f32 %v548_v47, %v562_v55  ;;  %v581_v60 = vadd.f32 %v580_v56, %v574_v14  ;;  %v2450_v36 = vsub.f32 %v549_v49, %v562_v55 }
 0x1e0   :  { %v2452_v61 = vsub.f32 %v550_v26, %v562_v55 }
 0x1e1   :  { %582 = vadd.xlane.f32.xlu2 %v581_v60  ;;  %v575_v63 = vmul.f32 %v2446_v57, %v2446_v57  ;;  %v576_v0 = vmul.f32 %v2448_v58, %v2448_v58  ;;  %v577_v25 = vmul.f32 %v2450_v36, %v2450_v36 }
 0x1e2   :  { %v578_v17 = vmul.f32 %v2452_v61, %v2452_v61 }
 0x1e3   :  { %v584_v1 = vadd.f32 %v576_v0, %v575_v63 }
 0x1e4   :  { %v2470_v46 = vpop.permute.xlu2 %1084 }
 0x1e5   :  { %v585_v23 = vadd.f32 %v584_v1, %v577_v25 }
 0x1e7   :  { %v586_v24 = vadd.f32 %v585_v23, %v578_v17 }
 0x1e9   :  { %587 = vadd.xlane.f32.xlu0 %v586_v24 }
 0x254   :  { %v583_v30 = vpop.xlane.xlu2 %582 }
 0x255   :  { %v589_v9 = vmul.f32 0.001953125, %v583_v30 }
 0x257   :  { %v591_v10 = vadd.f32 1e-05, %v589_v9 }
 0x259   :  { %1914 = vrsqrt.f32 %v591_v10  ;;  %vm599_vm9 = vweird.f32 %v591_v10 }
 0x25c   :  { %v588_v20 = vpop.xlane.xlu0 %587 }
 0x25d   :  { %v590_v12 = vmul.f32 0.001953125, %v588_v20 }
 0x25f   :  { %v1915_v13 = vpop.eup %1914  ;;  %v592_v4 = vadd.f32 1e-05, %v590_v12 }
 0x260   :  { %v594_v18 = vmul.f32 %v1915_v13, %v591_v10  ;;  %vm600_vm1 = vweird.f32 %v1915_v13 }
 0x261   :  { %1916 = vrsqrt.f32 %v592_v4  ;;  %vm601_vm11 = vmor %vm599_vm9, %vm600_vm1  ;;  %vm609_vm14 = vweird.f32 %v592_v4  ;;  %vm745_vm1 = vcmask 130048  }
 0x262   :  { %v595_v15 = vmul.f32 %v1915_v13, %v594_v18 }
 0x264   :  { %v596_v37 = vmul.f32 0.5, %v595_v15 }
 0x266   :  { %v597_v43 = vsub.f32 1.5, %v596_v37 }
 0x267   :  { %v1917_v19 = vpop.eup %1916 }
 0x268   :  { %v604_v21 = vmul.f32 %v1917_v19, %v592_v4  ;;  %v598_v7 = vmul.f32 %v1915_v13, %v597_v43  ;;  %vm610_vm12 = vweird.f32 %v1917_v19 }
 0x269   :  { %vm611_vm15 = vmor %vm609_vm14, %vm610_vm12 }
 0x26a   :  { %v605_v59 = vmul.f32 %v1917_v19, %v604_v21  ;;  %v602_v28 = vsel %vm601_vm11, %v1915_v13, %v598_v7 }
 0x26b   :  { %v615_v31 = vmul.f32 %v613_v27, %v602_v28 }
 0x26c   :  { %v606_v41 = vmul.f32 0.5, %v605_v59 }
 0x26d   :  { %619 = vperm.xlu2 %1910, %v615_v31  }
 0x26e   :  { %v607_v52 = vsub.f32 1.5, %v606_v41 }
 0x270   :  { %v608_v44 = vmul.f32 %v1917_v19, %v607_v52 }
 0x272   :  { %v612_v38 = vsel %vm611_vm15, %v1917_v19, %v608_v44 }
 0x273   :  { %v616_v8 = vmul.f32 %v614_v45, %v612_v38  ;;  %v2709_v38 = vld [vmem:[#allocation4 + $0x1] ss:$8 sm:$0xf] }
 0x275   :  { %624 = vperm.xlu1 %1912, %v616_v8  }
 0x2c7   :  { %v620_v40 = vpop.permute.xlu2 %619 }
 0x2c8   :  { %v628_v47 = vmul.f32 %v620_v40, %v2431_v51  ;;  %v629_v48 = vmul.f32 %v620_v40, %v2433_v53  ;;  %v630_v49 = vmul.f32 %v620_v40, %v2435_v42  ;;  %v627_v5 = vmul.f32 %v620_v40, %v2429_v3  ;;  %v2508_v51 = vpop.permute.xlu1 %743 }
 0x2ca   :  { %v2484_v26 = vadd.f32 %v2427_v50, %v628_v47  ;;  %v2487_v29 = vadd.f32 %v2427_v50, %v629_v48  ;;  %v2490_v54 = vadd.f32 %v2427_v50, %v630_v49  ;;  %v2500_v2 = vadd.f32 %v2427_v50, %v627_v5 }
 0x2cb   :  { %v726_v47 = vperm.slane %v2709_v38, 1 }
 0x2cc   :  { %710 = vrot.lane.b32.xlu0 %v2490_v54, %s1975_s24  ;;  %706 = vrot.lane.b32.xlu1 %v2487_v29, %s1975_s24 }
 0x2cd   :  { %702 = vrot.lane.b32.xlu2 %v2484_v26, %s1975_s24 }
 0x2d0   :  { %v2522_v50 = vpop.permute.xlu1 %1303 }
 0x2d4   :  { %663 = vrot.lane.b32.xlu1 %v2487_v29, %s1973_s9  ;;  %698 = vrot.lane.b32.xlu0 %v2500_v2, %s1975_s24 }
 0x2d5   :  { %659 = vrot.lane.b32.xlu2 %v2484_v26, %s1973_s9 }
 0x2d8   :  { %v2530_v3 = vpop.permute.xlu1 %1434 }
 0x2dc   :  { %655 = vrot.lane.b32.xlu1 %v2500_v2, %s1973_s9  ;;  %667 = vrot.lane.b32.xlu0 %v2490_v54, %s1973_s9 }
 0x2dd   :  { %918 = vrot.lane.b32.xlu2 %v2487_v29, %s1974_s2 }
 0x2e0   :  { %v2538_v53 = vpop.permute.xlu1 %1565 }
 0x2e1   :  { %3044 = vst [vmem:[#allocation10_spill] sm:$0xff] %v2538_v53 }
 0x2e4   :  { %922 = vrot.lane.b32.xlu1 %v2490_v54, %s1974_s2  ;;  %914 = vrot.lane.b32.xlu0 %v2484_v26, %s1974_s2 }
 0x2e5   :  { %1049 = vrot.lane.b32.xlu2 %v2487_v29, %s1976_s1 }
 0x2e8   :  { %v625_v42 = vpop.permute.xlu1 %624 }
 0x2e9   :  { %v632_v33 = vmul.f32 %v625_v42, %v2448_v58  ;;  %v631_v11 = vmul.f32 %v625_v42, %v2446_v57  ;;  %v633_v16 = vmul.f32 %v625_v42, %v2450_v36  ;;  %v634_v14 = vmul.f32 %v625_v42, %v2452_v61 }
 0x2eb   :  { %v2554_v34 = vadd.f32 %v2468_v22, %v632_v33  ;;  %v2564_v62 = vadd.f32 %v2468_v22, %v631_v11  ;;  %v2574_v55 = vadd.f32 %v2468_v22, %v633_v16  ;;  %v2584_v56 = vadd.f32 %v2468_v22, %v634_v14 }
 0x2ec   :  { %910 = vrot.lane.b32.xlu1 %v2500_v2, %s1974_s2  ;;  %1045 = vrot.lane.b32.xlu0 %v2484_v26, %s1976_s1 }
 0x2ed   :  { %1260 = vrot.lane.b32.xlu2 %v2500_v2, %s1977_s25 }
 0x2f4   :  { %1053 = vrot.lane.b32.xlu1 %v2490_v54, %s1976_s1  ;;  %1272 = vrot.lane.b32.xlu0 %v2490_v54, %s1977_s25 }
 0x2f5   :  { %1391 = vrot.lane.b32.xlu2 %v2500_v2, %s1978_s26 }
 0x2fc   :  { %1041 = vrot.lane.b32.xlu1 %v2500_v2, %s1976_s1  ;;  %1264 = vrot.lane.b32.xlu0 %v2484_v26, %s1977_s25 }
 0x2fd   :  { %1522 = vrot.lane.b32.xlu2 %v2500_v2, %s1979_s27 }
 0x304   :  { %1268 = vrot.lane.b32.xlu1 %v2487_v29, %s1977_s25  ;;  %1403 = vrot.lane.b32.xlu0 %v2490_v54, %s1978_s26 }
 0x305   :  { %1653 = vrot.lane.b32.xlu2 %v2500_v2, %s1980_s28 }
 0x30c   :  { %1399 = vrot.lane.b32.xlu1 %v2487_v29, %s1978_s26  ;;  %1395 = vrot.lane.b32.xlu0 %v2484_v26, %s1978_s26 }
 0x30d   :  { %704 = vrot.lane.b32.xlu2 %v2554_v34, %s1975_s24 }
 0x314   :  { %1530 = vrot.lane.b32.xlu1 %v2487_v29, %s1979_s27  ;;  %1534 = vrot.lane.b32.xlu0 %v2490_v54, %s1979_s27 }
 0x315   :  { %700 = vrot.lane.b32.xlu2 %v2564_v62, %s1975_s24 }
 0x31c   :  { %708 = vrot.lane.b32.xlu1 %v2574_v55, %s1975_s24  ;;  %1526 = vrot.lane.b32.xlu0 %v2484_v26, %s1979_s27 }
 0x31d   :  { %665 = vrot.lane.b32.xlu2 %v2574_v55, %s1973_s9 }
 0x324   :  { %669 = vrot.lane.b32.xlu1 %v2584_v56, %s1973_s9  ;;  %712 = vrot.lane.b32.xlu0 %v2584_v56, %s1975_s24 }
 0x325   :  { %657 = vrot.lane.b32.xlu2 %v2564_v62, %s1973_s9 }
 0x327   :  { %v2592_v57 = vpop.permute.xlu2 %702 }
 0x32c   :  { %924 = vrot.lane.b32.xlu1 %v2584_v56, %s1974_s2  ;;  %661 = vrot.lane.b32.xlu0 %v2554_v34, %s1973_s9 }
 0x32d   :  { %920 = vrot.lane.b32.xlu2 %v2574_v55, %s1974_s2 }
 0x32f   :  { %v660_v58 = vpop.permute.xlu2 %659 }
 0x334   :  { %1055 = vrot.lane.b32.xlu1 %v2584_v56, %s1976_s1  ;;  %916 = vrot.lane.b32.xlu0 %v2554_v34, %s1974_s2 }
 0x335   :  { %1051 = vrot.lane.b32.xlu2 %v2574_v55, %s1976_s1 }
 0x337   :  { %v919_v60 = vpop.permute.xlu2 %918 }
 0x33c   :  { %1661 = vrot.lane.b32.xlu1 %v2487_v29, %s1980_s28  ;;  %912 = vrot.lane.b32.xlu0 %v2564_v62, %s1974_s2 }
 0x33d   :  { %1262 = vrot.lane.b32.xlu2 %v2564_v62, %s1977_s25 }
 0x33e   :  { %v711_v36 = vpop.permute.xlu0 %710  ;;  %v707_v61 = vpop.permute.xlu1 %706 }
 0x33f   :  { %v2614_v63 = vsel %vm96_vm2, %v707_v61, %v711_v36  ;;  %v2619_v0 = vsel %vm96_vm2, %v2592_v57, %v707_v61  ;;  %v1050_v25 = vpop.permute.xlu2 %1049 }
 0x344   :  { %1270 = vrot.lane.b32.xlu1 %v2574_v55, %s1977_s25  ;;  %1047 = vrot.lane.b32.xlu0 %v2554_v34, %s1976_s1 }
 0x345   :  { %1266 = vrot.lane.b32.xlu2 %v2554_v34, %s1977_s25 }
 0x346   :  { %v664_v1 = vpop.permute.xlu1 %663  ;;  %v699_v17 = vpop.permute.xlu0 %698 }
 0x347   :  { %v2629_v23 = vsel %vm83_vm4, %v660_v58, %v664_v1  ;;  %v1261_v24 = vpop.permute.xlu2 %1260  ;;  %v2633_v22 = vsel %vm96_vm2, %v711_v36, %v699_v17  ;;  %v718_v33 = vsel %vm96_vm2, %v699_v17, %v2592_v57 }
 0x348   :  { %v734_v14 = vmul.f32 %v726_v47, %v718_v33 }
 0x34c   :  { %1401 = vrot.lane.b32.xlu1 %v2574_v55, %s1978_s26  ;;  %1043 = vrot.lane.b32.xlu0 %v2564_v62, %s1976_s1 }
 0x34d   :  { %1393 = vrot.lane.b32.xlu2 %v2564_v62, %s1978_s26 }
 0x34e   :  { %v656_v30 = vpop.permute.xlu1 %655  ;;  %v668_v9 = vpop.permute.xlu0 %667 }
 0x34f   :  { %v2641_v10 = vpop.permute.xlu2 %1391  ;;  %v2645_v20 = vsel %vm83_vm4, %v656_v30, %v660_v58  ;;  %v2649_v12 = vsel %vm83_vm4, %v664_v1, %v668_v9  ;;  %v2653_v13 = vsel %vm83_vm4, %v668_v9, %v656_v30  ;;  %v1784_v1 = vld [vmem:[#allocation3] sm:$0x1] }
 0x354   :  { %1532 = vrot.lane.b32.xlu1 %v2574_v55, %s1979_s27  ;;  %1274 = vrot.lane.b32.xlu0 %v2584_v56, %s1977_s25 }
 0x355   :  { %1397 = vrot.lane.b32.xlu2 %v2554_v34, %s1978_s26 }
 0x356   :  { %v923_v4 = vpop.permute.xlu1 %922  ;;  %v915_v18 = vpop.permute.xlu0 %914 }
 0x357   :  { %v2661_v15 = vpop.permute.xlu2 %1522  ;;  %v2665_v37 = vsel %vm109_vm3, %v919_v60, %v923_v4  ;;  %v2669_v43 = vsel %vm109_vm3, %v915_v18, %v919_v60 }
 0x35c   :  { %1663 = vrot.lane.b32.xlu1 %v2574_v55, %s1980_s28  ;;  %1405 = vrot.lane.b32.xlu0 %v2584_v56, %s1978_s26 }
 0x35d   :  { %1524 = vrot.lane.b32.xlu2 %v2564_v62, %s1979_s27 }
 0x35e   :  { %v911_v19 = vpop.permute.xlu1 %910  ;;  %v1046_v21 = vpop.permute.xlu0 %1045 }
 0x35f   :  { %v2677_v7 = vpop.permute.xlu2 %1653  ;;  %v2681_v27 = vsel %vm109_vm3, %v911_v19, %v915_v18  ;;  %v2685_v59 = vsel %vm109_vm3, %v923_v4, %v911_v19  ;;  %v2689_v28 = vsel %vm122_vm5, %v1046_v21, %v1050_v25 }
 0x364   :  { %1657 = vrot.lane.b32.xlu1 %v2484_v26, %s1980_s28  ;;  %1536 = vrot.lane.b32.xlu0 %v2584_v56, %s1979_s27 }
 0x365   :  { %1528 = vrot.lane.b32.xlu2 %v2554_v34, %s1979_s27  ;;  %s1823_s27 = sshll.u32 %s3041_s10, 4  ;;  %s1824_s27 = int_to_ptr.hbm [resolvable:$true] %s1823_s27 }
 0x366   :  { %v1054_v31 = vpop.permute.xlu1 %1053  ;;  %v1273_v41 = vpop.permute.xlu0 %1272 }
 0x367   :  { %v705_v52 = vpop.permute.xlu2 %704  ;;  %v2699_v44 = vsel %vm122_vm5, %v1050_v25, %v1054_v31  ;;  %v2703_v45 = vsel %vm135_vm7, %v1273_v41, %v1261_v24 }
 0x36c   :  { %1667 = vrot.lane.b32.xlu0 %v2584_v56, %s1980_s28 }
 0x36d   :  { %1655 = vrot.lane.b32.xlu2 %v2564_v62, %s1980_s28 }
 0x36e   :  { %v1042_v8 = vpop.permute.xlu1 %1041  ;;  %v1265_v40 = vpop.permute.xlu0 %1264 }
 0x36f   :  { %v701_v48 = vpop.permute.xlu2 %700  ;;  %v2714_v49 = vsel %vm122_vm5, %v1042_v8, %v1046_v21  ;;  %v2718_v5 = vsel %vm122_vm5, %v1054_v31, %v1042_v8  ;;  %v2722_v42 = vsel %vm135_vm7, %v1261_v24, %v1265_v40 }
 0x370   :  { %v719_v11 = vsel %vm96_vm2, %v701_v48, %v705_v52 }
 0x371   :  { %v738_v16 = vmul.f32 %v726_v47, %v719_v11 }
 0x373   :  { %782 = vmatpush.msra.mxu1 %v738_v16 }
 0x374   :  { %1665 = vrot.lane.b32.xlu0 %v2490_v54, %s1980_s28 }
 0x375   :  { %1659 = vrot.lane.b32.xlu2 %v2554_v34, %s1980_s28  ;;  %783 = vmatpush.msra.mxu1 %v734_v14 }
 0x376   :  { %1858 = vmatmul.msk.f32.vlgmr.msra.gmra.mxu1 %vm745_vm1, %v2508_v51  ;;  %v1269_v58 = vpop.permute.xlu1 %1268  ;;  %v1404_v60 = vpop.permute.xlu0 %1403 }
 0x377   :  { %v2735_v57 = vpop.permute.xlu2 %665  ;;  %v2739_v36 = vsel %vm135_vm7, %v1269_v58, %v1273_v41  ;;  %v2743_v61 = vsel %vm135_vm7, %v1265_v40, %v1269_v58  ;;  %v2748_v25 = vsel %vm148_vm10, %v1404_v60, %v2641_v10  ;;  %v727_v40 = vperm.slane %v2709_v38, 2 }
 0x37c   :  { %1787 = vperm.xlu0 %1911, %v1784_v1   ;;  %v728_v1 = vperm.slane %v2709_v38, 3 }
 0x37e   :  { %v1400_v17 = vpop.permute.xlu1 %1399  ;;  %v1396_v24 = vpop.permute.xlu0 %1395 }
 0x37f   :  { %v658_v30 = vpop.permute.xlu2 %657  ;;  %v2752_v9 = vsel %vm148_vm10, %v1400_v17, %v1404_v60  ;;  %v2756_v4 = vsel %vm148_vm10, %v1396_v24, %v1400_v17  ;;  %v2761_v18 = vsel %vm148_vm10, %v2641_v10, %v1396_v24  ;;  %v735_v60 = vmul.f32 %v727_v40, %v2619_v0 }
 0x386   :  { %v1531_v19 = vpop.permute.xlu1 %1530  ;;  %v1535_v21 = vpop.permute.xlu0 %1534 }
 0x387   :  { %v2763_v31 = vpop.permute.xlu2 %920  ;;  %v2767_v41 = vsel %vm161_vm8, %v1531_v19, %v1535_v21  ;;  %v2772_v8 = vsel %vm161_vm8, %v1535_v21, %v2661_v15 }
 0x38e   :  { %v709_v47 = vpop.permute.xlu1 %708  ;;  %v1527_v33 = vpop.permute.xlu0 %1526 }
 0x38f   :  { %v2775_v11 = vpop.permute.xlu2 %1051  ;;  %v717_v10 = vsel %vm96_vm2, %v705_v52, %v709_v47  ;;  %v2781_v16 = vsel %vm161_vm8, %v1527_v33, %v1531_v19  ;;  %v2786_v14 = vsel %vm161_vm8, %v2661_v15, %v1527_v33  ;;  %v725_v52 = vperm.slane %v2709_v38, 0  ;;  %v679_v33 = vld [vmem:[#allocation4] ss:$8 sm:$0xf] }
 0x390   :  { %v739_v58 = vmul.f32 %v727_v40, %v717_v10  ;;  %v681_v32 = vperm.slane %v679_v33, 0  ;;  %v684_v53 = vperm.slane %v679_v33, 3 }
 0x392   :  { %802 = vmatpush.msra.mxu2 %v739_v58  ;;  %v736_v58 = vmul.f32 %v728_v1, %v2614_v63  ;;  %v682_v63 = vperm.slane %v679_v33, 1 }
 0x394   :  { %803 = vmatpush.msra.mxu2 %v735_v60  ;;  %v733_v60 = vmul.f32 %v725_v52, %v2633_v22  ;;  %v689_v22 = vmul.f32 %v681_v32, %v2653_v13 }
 0x395   :  { %1859 = vmatmul.msk.f32.vlgmr.msra.gmra.mxu2 %vm745_vm1, %v2508_v51 }
 0x396   :  { %v670_v17 = vpop.permute.xlu1 %669  ;;  %v713_v24 = vpop.permute.xlu0 %712 }
 0x397   :  { %v2793_v19 = vpop.permute.xlu2 %1262  ;;  %v715_v15 = vsel %vm96_vm2, %v709_v47, %v713_v24  ;;  %v721_v21 = vsel %vm96_vm2, %v713_v24, %v701_v48  ;;  %v672_v10 = vsel %vm83_vm4, %v2735_v57, %v670_v17  ;;  %v678_v38 = vsel %vm83_vm4, %v670_v17, %v658_v30  ;;  %v2806_v47 = vld [vmem:[#allocation4 + $0x2] ss:$8 sm:$0xf] }
 0x398   :  { %v737_v0 = vmul.f32 %v725_v52, %v721_v21  ;;  %v740_v40 = vmul.f32 %v728_v1, %v715_v15  ;;  %v693_v48 = vmul.f32 %v681_v32, %v678_v38  ;;  %v696_v24 = vmul.f32 %v684_v53, %v672_v10 }
 0x399   :  { %v683_v17 = vperm.slane %v679_v33, 2  ;;  %v940_v1 = vperm.slane %v2806_v47, 3  ;;  %v692_v21 = vmul.f32 %v684_v53, %v2649_v12  ;;  %v697_v53 = vld [vmem:[%s3039_s8] sm:$0x1]  ;;  %v690_v38 = vmul.f32 %v682_v63, %v2645_v20 }
 0x39a   :  { %762 = vmatpush.msra.mxu0 %v737_v0  ;;  %822 = vmatpush.msra.mxu3 %v740_v40  ;;  %vm1807_vm2 = vcmask 1042434  }
 0x39b   :  { %v691_v12 = vmul.f32 %v683_v17, %v2629_v23 }
 0x39c   :  { %763 = vmatpush.msra.mxu0 %v733_v60  ;;  %823 = vmatpush.msra.mxu3 %v736_v58  ;;  %v939_v58 = vperm.slane %v2806_v47, 2 }
 0x39d   :  { %1857 = vmatmul.msk.f32.vlgmr.msra.gmra.mxu0 %vm745_vm1, %v2508_v51  ;;  %1860 = vmatmul.msk.f32.vlgmr.msra.gmra.mxu3 %vm745_vm1, %v2508_v51 }
 0x39e   :  { %844 = vmatpush.msrb.mxu0 %v693_v48  ;;  %904 = vmatpush.msrb.mxu3 %v696_v24  ;;  %v925_v52 = vpop.permute.xlu1 %924  ;;  %v662_v15 = vpop.permute.xlu0 %661 }
 0x39f   :  { %v2815_v0 = vpop.permute.xlu2 %1266  ;;  %v927_v40 = vsel %vm109_vm3, %v2763_v31, %v925_v52  ;;  %v674_v51 = vsel %vm83_vm4, %v662_v15, %v2735_v57  ;;  %v676_v32 = vsel %vm83_vm4, %v658_v30, %v662_v15  ;;  %v948_v57 = vmul.f32 %v940_v1, %v2665_v37  ;;  %v2831_v30 = vld [vmem:[#allocation4 + $0x3] ss:$8 sm:$0xf] }
 0x3a0   :  { %v952_v13 = vmul.f32 %v940_v1, %v927_v40  ;;  %v694_v33 = vmul.f32 %v682_v63, %v676_v32  ;;  %v695_v10 = vmul.f32 %v683_v17, %v674_v51  ;;  %845 = vmatpush.msrb.mxu0 %v689_v22  ;;  %905 = vmatpush.msrb.mxu3 %v692_v21  ;;  %v1071_v60 = vperm.slane %v2831_v30, 3 }
 0x3a1   :  { %v947_v22 = vmul.f32 %v939_v58, %v2669_v43  ;;  %v937_v15 = vperm.slane %v2806_v47, 0  ;;  %v938_v21 = vperm.slane %v2806_v47, 1 }
 0x3a2   :  { %864 = vmatpush.msrb.mxu1 %v694_v33  ;;  %884 = vmatpush.msrb.mxu2 %v695_v10  ;;  %v1079_v1 = vmul.f32 %v1071_v60, %v2699_v44  ;;  %v1070_v10 = vperm.slane %v2831_v30, 2 }
 0x3a3   :  { %1031 = vmatpush.msra.mxu3 %v952_v13  ;;  %v945_v13 = vmul.f32 %v937_v15, %v2685_v59  ;;  %v946_v33 = vmul.f32 %v938_v21, %v2681_v27 }
 0x3a4   :  { %865 = vmatpush.msrb.mxu1 %v690_v38  ;;  %885 = vmatpush.msrb.mxu2 %v691_v12  ;;  %v1069_v12 = vperm.slane %v2831_v30, 1 }
 0x3a5   :  { %1032 = vmatpush.msra.mxu3 %v948_v57  ;;  %1861 = vmatmul.msk.f32.vlgmr.msrb.gmra.mxu0 %vm745_vm1, %v697_v53 }
 0x3a6   :  { %1862 = vmatmul.msk.f32.vlgmr.msrb.gmra.mxu1 %vm745_vm1, %v697_v53  ;;  %1863 = vmatmul.msk.f32.vlgmr.msrb.gmra.mxu2 %vm745_vm1, %v697_v53  ;;  %v1056_v23 = vpop.permute.xlu1 %1055  ;;  %v917_v20 = vpop.permute.xlu0 %916 }
 0x3a7   :  { %1864 = vmatmul.msk.f32.vlgmr.msrb.gmra.mxu3 %vm745_vm1, %v697_v53  ;;  %v2839_v37 = vpop.permute.xlu2 %1393  ;;  %v1058_v48 = vsel %vm122_vm5, %v2775_v11, %v1056_v23  ;;  %v929_v24 = vsel %vm109_vm3, %v917_v20, %v2763_v31  ;;  %v1078_v53 = vmul.f32 %v1070_v10, %v2689_v28 }
 0x3a8   :  { %v1083_v17 = vmul.f32 %v1071_v60, %v1058_v48  ;;  %v951_v63 = vmul.f32 %v939_v58, %v929_v24  ;;  %v1281_v24 = vsel %vm135_vm7, %v2793_v19, %v2815_v0 }
 0x3aa   :  { %1011 = vmatpush.msra.mxu2 %v951_v63  ;;  %1162 = vmatpush.msrb.mxu3 %v1083_v17 }
 0x3ac   :  { %1012 = vmatpush.msra.mxu2 %v947_v22  ;;  %1163 = vmatpush.msrb.mxu3 %v1079_v1 }
 0x3ae   :  { %1867 = vmatmul.msk.f32.vlgmr.msra.gmra.mxu2 %vm745_vm1, %v2466_v39  ;;  %v2853_v40 = vpop.permute.xlu1 %1661  ;;  %v913_v31 = vpop.permute.xlu0 %912 }
 0x3af   :  { %1868 = vmatmul.msk.f32.vlgmr.msra.gmra.mxu3 %vm745_vm1, %v2466_v39  ;;  %v2857_v43 = vpop.permute.xlu2 %1397  ;;  %v931_v44 = vsel %vm109_vm3, %v913_v31, %v917_v20  ;;  %v933_v51 = vsel %vm109_vm3, %v925_v52, %v913_v31  ;;  %v1285_v20 = vld [vmem:[#allocation4 + $0x5] ss:$8 sm:$0xf] }
 0x3b0   :  { %1250 = vmatpush.msra.mxu3 %v2584_v56  ;;  %v949_v47 = vmul.f32 %v937_v15, %v933_v51  ;;  %v950_v32 = vmul.f32 %v938_v21, %v931_v44  ;;  %v1289_v17 = vperm.slane %v1285_v20, 2  ;;  %v1416_v44 = vld [vmem:[#allocation4 + $0x6] ss:$8 sm:$0xf]  ;;  %v1412_v51 = vsel %vm148_vm10, %v2839_v37, %v2857_v43 }
 0x3b2   :  { %1251 = vmatpush.msra.mxu3 %v2490_v54  ;;  %971 = vmatpush.msra.mxu0 %v949_v47  ;;  %v1297_v47 = vmul.f32 %v1289_v17, %v2739_v36  ;;  %v1420_v36 = vperm.slane %v1416_v44, 2 }
 0x3b3   :  { %991 = vmatpush.msra.mxu1 %v950_v32  ;;  %v1418_v32 = vperm.slane %v1416_v44, 0 }
 0x3b4   :  { %972 = vmatpush.msra.mxu0 %v945_v13 }
 0x3b5   :  { %992 = vmatpush.msra.mxu1 %v946_v33  ;;  %1865 = vmatmul.msk.f32.vlgmr.msra.gmra.mxu0 %vm745_vm1, %v2466_v39 }
 0x3b6   :  { %1866 = vmatmul.msk.f32.vlgmr.msra.gmra.mxu1 %vm745_vm1, %v2466_v39  ;;  %v1271_v56 = vpop.permute.xlu1 %1270  ;;  %v1048_v52 = vpop.permute.xlu0 %1047  ;;  %v1068_v39 = vperm.slane %v2831_v30, 0 }
 0x3b7   :  { %1872 = vmatmul.msk.f32.vlgmr.msrb.gmra.mxu3 %vm745_vm1, %v2470_v46  ;;  %v1060_v54 = vsel %vm122_vm5, %v1048_v52, %v2775_v11  ;;  %v2877_v59 = vpop.permute.xlu2 %1524 }
 0x3b8   :  { %v1082_v27 = vmul.f32 %v1070_v10, %v1060_v54  ;;  %v1076_v30 = vmul.f32 %v1068_v39, %v2718_v5  ;;  %v1288_v5 = vperm.slane %v1285_v20, 1 }
 0x3ba   :  { %1142 = vmatpush.msrb.mxu2 %v1082_v27  ;;  %v1547_v27 = vld [vmem:[#allocation4 + $0x7] ss:$8 sm:$0xf] }
 0x3bc   :  { %1143 = vmatpush.msrb.mxu2 %v1078_v53 }
 0x3bd   :  { %1871 = vmatmul.msk.f32.vlgmr.msrb.gmra.mxu2 %vm745_vm1, %v2470_v46 }
 0x3be   :  { %1230 = vmatpush.msra.mxu2 %v2574_v55  ;;  %v2885_v38 = vpop.permute.xlu1 %1401  ;;  %v1044_v57 = vpop.permute.xlu0 %1043  ;;  %v1077_v55 = vmul.f32 %v1069_v12, %v2714_v49  ;;  %v1290_v49 = vperm.slane %v1285_v20, 3 }
 0x3bf   :  { %1876 = vmatmul.msk.f32.vlgmr.msra.gmra.mxu3 %vm745_vm1, %v2472_v6  ;;  %v1062_v28 = vsel %vm122_vm5, %v1044_v57, %v1048_v52  ;;  %v1064_v11 = vsel %vm122_vm5, %v1056_v23, %v1044_v57  ;;  %v2896_v48 = vpop.permute.xlu2 %1528  ;;  %v1279_v23 = vsel %vm135_vm7, %v2815_v0, %v1271_v56 }
 0x3c0   :  { %v1080_v58 = vmul.f32 %v1068_v39, %v1064_v11  ;;  %v1081_v60 = vmul.f32 %v1069_v12, %v1062_v28  ;;  %1231 = vmatpush.msra.mxu2 %v2487_v29  ;;  %v1287_v29 = vperm.slane %v1285_v20, 0  ;;  %v1300_v1 = vmul.f32 %v1288_v5, %v1279_v23  ;;  %v1678_v11 = vld [vmem:[#allocation4 + $0x20] ss:$8 sm:$0xf] }
 0x3c1   :  { %v1428_v39 = vmul.f32 %v1420_v36, %v2752_v9  ;;  %v1549_v12 = vperm.slane %v1547_v27, 0 }
 0x3c2   :  { %1102 = vmatpush.msrb.mxu0 %v1080_v58  ;;  %1122 = vmatpush.msrb.mxu1 %v1081_v60  ;;  %v1299_v0 = vmul.f32 %v1287_v29, %v1281_v24  ;;  %v1552_v60 = vperm.slane %v1547_v27, 3 }
 0x3c3   :  { %v1557_v9 = vmul.f32 %v1549_v12, %v2786_v14 }
 0x3c4   :  { %1103 = vmatpush.msrb.mxu0 %v1076_v30  ;;  %1123 = vmatpush.msrb.mxu1 %v1077_v55 }
 0x3c5   :  { %1869 = vmatmul.msk.f32.vlgmr.msrb.gmra.mxu0 %vm745_vm1, %v2470_v46  ;;  %1870 = vmatmul.msk.f32.vlgmr.msrb.gmra.mxu1 %vm745_vm1, %v2470_v46 }
 0x3c6   :  { %1190 = vmatpush.msra.mxu0 %v2564_v62  ;;  %1210 = vmatpush.msra.mxu1 %v2554_v34  ;;  %v2911_v63 = vpop.permute.xlu1 %1532  ;;  %v1275_v22 = vpop.permute.xlu0 %1274  ;;  %v1295_v34 = vmul.f32 %v1287_v29, %v2722_v42  ;;  %v1296_v62 = vmul.f32 %v1288_v5, %v2743_v61  ;;  %v1430_v42 = vmul.f32 %v1418_v32, %v1412_v51  ;;  %v1681_v5 = vperm.slane %v1678_v11, 1 }
 0x3c7   :  { %1875 = vmatmul.msk.f32.vlgmr.msra.gmra.mxu2 %vm745_vm1, %v2472_v6  ;;  %v1277_v15 = vsel %vm135_vm7, %v1271_v56, %v1275_v22  ;;  %v1283_v46 = vsel %vm135_vm7, %v1275_v22, %v2793_v19  ;;  %v1298_v19 = vmul.f32 %v1290_v49, %v2703_v45  ;;  %v2934_v13 = vpop.permute.xlu2 %1655  ;;  %v1421_v45 = vperm.slane %v1416_v44, 3 }
 0x3c8   :  { %v1301_v21 = vmul.f32 %v1289_v17, %v1277_v15  ;;  %v1302_v31 = vmul.f32 %v1290_v49, %v1283_v46  ;;  %1191 = vmatpush.msra.mxu0 %v2500_v2  ;;  %1211 = vmatpush.msra.mxu1 %v2484_v26  ;;  %v1410_v26 = vsel %vm148_vm10, %v2857_v43, %v2885_v38  ;;  %v1419_v2 = vperm.slane %v1416_v44, 1 }
 0x3c9   :  { %v1426_v43 = vmul.f32 %v1418_v32, %v2761_v18  ;;  %v1429_v53 = vmul.f32 %v1421_v45, %v2748_v25  ;;  %v1551_v25 = vperm.slane %v1547_v27, 2  ;;  %v1560_v49 = vmul.f32 %v1552_v60, %v2772_v8 }
 0x3ca   :  { %1321 = vmatpush.msrb.mxu0 %v1299_v0  ;;  %1341 = vmatpush.msrb.mxu1 %v1300_v1  ;;  %v1431_v61 = vmul.f32 %v1419_v2, %v1410_v26  ;;  %v1427_v10 = vmul.f32 %v1419_v2, %v2756_v4  ;;  %v1543_v4 = vsel %vm161_vm8, %v2877_v59, %v2896_v48  ;;  %v3045_v1 = vld [vmem:[#allocation10_spill] sm:$0xff]  ;;  %v1696_v26 = vld [vmem:[%s3039_s8 + $0x1] sm:$0x1]  ;;  %s1986_s8 = smov [#allocation7]  }
 0x3cb   :  { %1361 = vmatpush.msrb.mxu2 %v1301_v21  ;;  %1381 = vmatpush.msrb.mxu3 %v1302_v31  ;;  %v1561_v57 = vmul.f32 %v1549_v12, %v1543_v4  ;;  %s1821_s1 = sshll.u32 %s1986_s8, 4  ;;  %s1822_s1 = int_to_ptr.vmem [resolvable:$true] %s1821_s1 }
 0x3cc   :  { %1322 = vmatpush.msrb.mxu0 %v1295_v34  ;;  %1342 = vmatpush.msrb.mxu1 %v1296_v62 }
 0x3cd   :  { %1362 = vmatpush.msrb.mxu2 %v1297_v47  ;;  %1382 = vmatpush.msrb.mxu3 %v1298_v19 }
 0x3ce   :  { %1873 = vmatmul.msk.f32.vlgmr.msra.gmra.mxu0 %vm745_vm1, %v2472_v6  ;;  %1874 = vmatmul.msk.f32.vlgmr.msra.gmra.mxu1 %vm745_vm1, %v2472_v6  ;;  %v1406_v33 = vpop.permute.xlu0 %1405  ;;  %v2946_v56 = vpop.permute.xlu1 %1663 }
 0x3cf   :  { %1880 = vmatmul.msk.f32.vlgmr.msrb.gmra.mxu3 %vm745_vm1, %v2522_v50  ;;  %1452 = vmatpush.msra.mxu0 %v1430_v42  ;;  %v1408_v6 = vsel %vm148_vm10, %v2885_v38, %v1406_v33  ;;  %v1414_v18 = vsel %vm148_vm10, %v1406_v33, %v2839_v37  ;;  %v1541_v37 = vsel %vm161_vm8, %v2896_v48, %v2911_v63  ;;  %v1550_v38 = vperm.slane %v1547_v27, 1  ;;  %v1660_v55 = vpop.permute.xlu2 %1659 }
 0x3d0   :  { %1879 = vmatmul.msk.f32.vlgmr.msrb.gmra.mxu2 %vm745_vm1, %v2522_v50  ;;  %1472 = vmatpush.msra.mxu1 %v1431_v61  ;;  %v1432_v52 = vmul.f32 %v1420_v36, %v1408_v6  ;;  %v1433_v54 = vmul.f32 %v1421_v45, %v1414_v18  ;;  %v1680_v48 = vperm.slane %v1678_v11, 0  ;;  %v1674_v29 = vsel %vm174_vm13, %v2934_v13, %v1660_v55 }
 0x3d1   :  { %1453 = vmatpush.msra.mxu0 %v1426_v43  ;;  %v1562_v28 = vmul.f32 %v1550_v38, %v1541_v37  ;;  %v1558_v30 = vmul.f32 %v1550_v38, %v2781_v16  ;;  %v1559_v16 = vmul.f32 %v1551_v25, %v2767_v41  ;;  %v1683_v41 = vperm.slane %v1678_v11, 3 }
 0x3d2   :  { %1473 = vmatpush.msra.mxu1 %v1427_v10  ;;  %1492 = vmatpush.msra.mxu2 %v1432_v52  ;;  %v1692_v22 = vmul.f32 %v1680_v48, %v1674_v29 }
 0x3d3   :  { %1512 = vmatpush.msra.mxu3 %v1433_v54 }
 0x3d4   :  { %1493 = vmatpush.msra.mxu2 %v1428_v39 }
 0x3d5   :  { %1513 = vmatpush.msra.mxu3 %v1429_v53 }
 0x3d6   :  { %1877 = vmatmul.msk.f32.vlgmr.msrb.gmra.mxu0 %vm745_vm1, %v2522_v50  ;;  %1878 = vmatmul.msk.f32.vlgmr.msrb.gmra.mxu1 %vm745_vm1, %v2522_v50  ;;  %v1537_v58 = vpop.permute.xlu0 %1536  ;;  %v1658_v24 = vpop.permute.xlu1 %1657 }
 0x3d7   :  { %1884 = vmatmul.msk.f32.vlgmr.msra.gmra.mxu3 %vm745_vm1, %v2530_v3  ;;  %1583 = vmatpush.msrb.mxu0 %v1561_v57  ;;  %v1539_v50 = vsel %vm161_vm8, %v2911_v63, %v1537_v58  ;;  %v1545_v14 = vsel %vm161_vm8, %v1537_v58, %v2877_v59  ;;  %v1672_v59 = vsel %vm174_vm13, %v1660_v55, %v2946_v56  ;;  %v1682_v63 = vperm.slane %v1678_v11, 2 }
 0x3d8   :  { %1883 = vmatmul.msk.f32.vlgmr.msra.gmra.mxu2 %vm745_vm1, %v2530_v3  ;;  %1603 = vmatpush.msrb.mxu1 %v1562_v28  ;;  %v1563_v20 = vmul.f32 %v1551_v25, %v1539_v50  ;;  %v1564_v23 = vmul.f32 %v1552_v60, %v1545_v14  ;;  %v1673_v17 = vsel %vm174_vm13, %v2677_v7, %v1658_v24 }
 0x3d9   :  { %1584 = vmatpush.msrb.mxu0 %v1557_v9  ;;  %v1671_v0 = vsel %vm174_vm13, %v1658_v24, %v2853_v40  ;;  %v1693_v8 = vmul.f32 %v1681_v5, %v1672_v59  ;;  %v1688_v46 = vmul.f32 %v1680_v48, %v1673_v17 }
 0x3da   :  { %1604 = vmatpush.msrb.mxu1 %v1558_v30  ;;  %1623 = vmatpush.msrb.mxu2 %v1563_v20  ;;  %v1689_v34 = vmul.f32 %v1681_v5, %v1671_v0 }
 0x3db   :  { %1643 = vmatpush.msrb.mxu3 %v1564_v23 }
 0x3dc   :  { %1624 = vmatpush.msrb.mxu2 %v1559_v16 }
 0x3dd   :  { %1644 = vmatpush.msrb.mxu3 %v1560_v49 }
 0x3de   :  { %1881 = vmatmul.msk.f32.vlgmr.msra.gmra.mxu0 %vm745_vm1, %v2530_v3  ;;  %1882 = vmatmul.msk.f32.vlgmr.msra.gmra.mxu1 %vm745_vm1, %v2530_v3  ;;  %v1668_v15 = vpop.permute.xlu0 %1667 }
 0x3df   :  { %1888 = vmatmul.msk.f32.vlgmr.msrb.gmra.mxu3 %vm745_vm1, %v3045_v1  ;;  %1714 = vmatpush.msra.mxu0 %v1692_v22  ;;  %v1670_v21 = vsel %vm174_vm13, %v2946_v56, %v1668_v15  ;;  %v1676_v31 = vsel %vm174_vm13, %v1668_v15, %v2934_v13 }
 0x3e0   :  { %1887 = vmatmul.msk.f32.vlgmr.msrb.gmra.mxu2 %vm745_vm1, %v3045_v1  ;;  %1734 = vmatpush.msra.mxu1 %v1693_v8  ;;  %v1694_v3 = vmul.f32 %v1682_v63, %v1670_v21  ;;  %v1695_v62 = vmul.f32 %v1683_v41, %v1676_v31 }
 0x3e1   :  { %1715 = vmatpush.msra.mxu0 %v1688_v46 }
 0x3e2   :  { %1735 = vmatpush.msra.mxu1 %v1689_v34  ;;  %1754 = vmatpush.msra.mxu2 %v1694_v3 }
 0x3e3   :  { %1774 = vmatpush.msra.mxu3 %v1695_v62 }
 0x3e6   :  { %1885 = vmatmul.msk.f32.vlgmr.msrb.gmra.mxu0 %vm745_vm1, %v3045_v1  ;;  %1886 = vmatmul.msk.f32.vlgmr.msrb.gmra.mxu1 %vm745_vm1, %v3045_v1  ;;  %v1666_v44 = vpop.permute.xlu0 %1665 }
 0x3e7   :  { %v1669_v51 = vsel %vm174_vm13, %v2853_v40, %v1666_v44  ;;  %v1675_v19 = vsel %vm174_vm13, %v1666_v44, %v2677_v7 }
 0x3e8   :  { %v1690_v47 = vmul.f32 %v1682_v63, %v1669_v51  ;;  %v1691_v32 = vmul.f32 %v1683_v41, %v1675_v19 }
 0x3ea   :  { %1755 = vmatpush.msra.mxu2 %v1690_v47  ;;  %1775 = vmatpush.msra.mxu3 %v1691_v32 }
 0x3eb   :  { %1891 = vmatmul.msk.f32.vlgmr.msra.gmra.mxu2 %vm745_vm1, %v1696_v26  ;;  %1892 = vmatmul.msk.f32.vlgmr.msra.gmra.mxu3 %vm745_vm1, %v1696_v26 }
 0x3ee   :  { %1889 = vmatmul.msk.f32.vlgmr.msra.gmra.mxu0 %vm745_vm1, %v1696_v26  ;;  %1890 = vmatmul.msk.f32.vlgmr.msra.gmra.mxu1 %vm745_vm1, %v1696_v26  ;;  %v1788_v15 = vpop.permute.xlu0 %1787 }
 0x3ef   :  { %v1790_v47 = vperm.slane %v1788_v15, 0 }
 0x3f3   :  { %v785_v7 = vpop.f32.mrf.mxu1 }
 0x418   :  { %v805_v2 = vpop.f32.mrf.mxu2 }
 0x41a   :  { %v765_v35 = vpop.f32.mrf.mxu0 }
 0x420   :  { %v825_v40 = vpop.f32.mrf.mxu3 }
 0x422   :  { %v847_v13 = vpop.f32.mrf.mxu0 }
 0x423   :  { %v867_v45 = vpop.f32.mrf.mxu1  ;;  %v848_v58 = vadd.f32 %v847_v13, %v765_v35 }
 0x424   :  { %v868_v11 = vadd.f32 %v867_v45, %v785_v7 }
 0x429   :  { %v887_v61 = vpop.f32.mrf.mxu2 }
 0x42a   :  { %v907_v42 = vpop.f32.mrf.mxu3  ;;  %v888_v30 = vadd.f32 %v887_v61, %v805_v2 }
 0x42b   :  { %v908_v55 = vadd.f32 %v907_v42, %v825_v40 }
 0x431   :  { %v1014_v43 = vpop.f32.mrf.mxu2 }
 0x432   :  { %v1034_v36 = vpop.f32.mrf.mxu3  ;;  %v974_v33 = vpop.f32.mrf.mxu0  ;;  %v1039_v48 = vadd.f32 %v1014_v43, %v888_v30 }
 0x433   :  { %v994_v10 = vpop.f32.mrf.mxu1  ;;  %v1037_v50 = vadd.f32 %v974_v33, %v848_v58  ;;  %v1040_v24 = vadd.f32 %v1034_v36, %v908_v55 }
 0x434   :  { %v1038_v60 = vadd.f32 %v994_v10, %v868_v11 }
 0x43a   :  { %v1165_v56 = vpop.f32.mrf.mxu3 }
 0x43b   :  { %v1171_v5 = vadd.f32 %v1165_v56, %v1040_v24 }
 0x440   :  { %v1145_v6 = vpop.f32.mrf.mxu2 }
 0x441   :  { %v1170_v49 = vadd.f32 %v1145_v6, %v1039_v48 }
 0x442   :  { %v1105_v18 = vpop.f32.mrf.mxu0  ;;  %v1125_v52 = vpop.f32.mrf.mxu1 }
 0x443   :  { %v1253_v54 = vpop.f32.mrf.mxu3  ;;  %v1169_v14 = vadd.f32 %v1125_v52, %v1038_v60  ;;  %v1168_v23 = vadd.f32 %v1105_v18, %v1037_v50 }
 0x444   :  { %v1259_v22 = vadd.f32 %v1253_v54, %v1171_v5 }
 0x44a   :  { %v1233_v27 = vpop.f32.mrf.mxu2 }
 0x44b   :  { %v1193_v4 = vpop.f32.mrf.mxu0  ;;  %v1213_v53 = vpop.f32.mrf.mxu1  ;;  %v1258_v0 = vadd.f32 %v1233_v27, %v1170_v49  ;;  %v3046_v27 = vlaneseq }
 0x44c   :  { %v1257_v29 = vadd.f32 %v1213_v53, %v1169_v14  ;;  %v1256_v59 = vadd.f32 %v1193_v4, %v1168_v23 }
 0x44d   :  { %vm1813_vm3 = vcmp.lt.s32.totalorder %v3046_v27, 512 }
 0x452   :  { %v1384_v39 = vpop.f32.mrf.mxu3 }
 0x453   :  { %v1364_v12 = vpop.f32.mrf.mxu2  ;;  %v1324_v37 = vpop.f32.mrf.mxu0  ;;  %v1390_v21 = vadd.f32 %v1384_v39, %v1259_v22 }
 0x454   :  { %v1344_v38 = vpop.f32.mrf.mxu1  ;;  %v1387_v8 = vadd.f32 %v1324_v37, %v1256_v59  ;;  %v1389_v46 = vadd.f32 %v1364_v12, %v1258_v0 }
 0x455   :  { %v1388_v17 = vadd.f32 %v1344_v38, %v1257_v29 }
 0x45a   :  { %v1515_v9 = vpop.f32.mrf.mxu3 }
 0x45b   :  { %v1455_v57 = vpop.f32.mrf.mxu0  ;;  %v1495_v25 = vpop.f32.mrf.mxu2  ;;  %v1521_v44 = vadd.f32 %v1515_v9, %v1390_v21 }
 0x45c   :  { %v1475_v28 = vpop.f32.mrf.mxu1  ;;  %v1518_v31 = vadd.f32 %v1455_v57, %v1387_v8  ;;  %v1520_v62 = vadd.f32 %v1495_v25, %v1389_v46 }
 0x45d   :  { %v1519_v1 = vadd.f32 %v1475_v28, %v1388_v17 }
 0x462   :  { %v1646_v41 = vpop.f32.mrf.mxu3 }
 0x463   :  { %v1586_v20 = vpop.f32.mrf.mxu0  ;;  %v1626_v63 = vpop.f32.mrf.mxu2  ;;  %v1652_v40 = vadd.f32 %v1646_v41, %v1521_v44 }
 0x464   :  { %v1606_v16 = vpop.f32.mrf.mxu1  ;;  %v1649_v51 = vadd.f32 %v1586_v20, %v1518_v31  ;;  %v1651_v26 = vadd.f32 %v1626_v63, %v1520_v62 }
 0x465   :  { %v1650_v34 = vadd.f32 %v1606_v16, %v1519_v1 }
 0x46b   :  { %v1717_v3 = vpop.f32.mrf.mxu0 }
 0x46c   :  { %v1737_v19 = vpop.f32.mrf.mxu1  ;;  %v1780_v2 = vadd.f32 %v1717_v3, %v1649_v51 }
 0x46d   :  { %v1781_v32 = vadd.f32 %v1737_v19, %v1650_v34 }
 0x46e   :  { %v1757_v7 = vpop.f32.mrf.mxu2  ;;  %v1777_v42 = vpop.f32.mrf.mxu3  ;;  %v1791_v36 = vadd.f32 %v1790_v47, %v1780_v2 }
 0x46f   :  { %v1792_v35 = vadd.f32 %v1790_v47, %v1781_v32  ;;  %v1782_v61 = vadd.f32 %v1757_v7, %v1651_v26  ;;  %v1783_v13 = vadd.f32 %v1777_v42, %v1652_v40 }
 0x470   :  { %v1795_v18 = vmax.f32 %v1791_v36, 0.0 }
 0x471   :  { %v1796_v45 = vmax.f32 %v1792_v35, 0.0  ;;  %v1793_v43 = vadd.f32 %v1790_v47, %v1782_v61  ;;  %v1794_v33 = vadd.f32 %v1790_v47, %v1783_v13 }
 0x473   :  { %v1803_v10 = vrot.slane %v1796_v45, 7  ;;  %v1797_v56 = vmax.f32 %v1793_v43, 0.0  ;;  %v1798_v6 = vmax.f32 %v1794_v33, 0.0 }
 0x475   :  { %v1804_v52 = vrot.slane %v1797_v56, 6  ;;  %v1805_v54 = vrot.slane %v1798_v6, 5  ;;  %v1806_v4 = vsel %vm251_vm0, %v1795_v18, %v1803_v10 }
 0x477   :  { %v1808_v53 = vsel %vm1807_vm2, %v1804_v52, %v1805_v54 }
 0x478   :  { %v1809_v39 = vsel %vm256_vm6, %v1806_v4, %v1808_v53 }
 0x479   :  { %1815 = vst.msk [vmem:[#allocation7] sm:$0xf] %vm1813_vm3, %v1809_v39 }
 0x47a   :  { %1826 = dma.vmem_to_hbm [thread:$0]  %s1822_s1, 64, %s1824_s27, [#allocation6]  }
 0x47b   :  { %1968 = dma.done.wait [#allocation6], 64  }
 0x47c   :  { %1969 = vsyncadd [#allocation6], 4294967232 }
 0x47d   :  { %1831 = vsyncpa [#allocation5], 1 }
 0x47e   :  { %1832 = vsyncpa [#allocation6], 1 }

</bundles_post_ra>
